<compile_context>
chip_gen: v7x
topology: tpu7x:2x2x1
jax: 0.10.0
libtpu: 0.0.40
codegen_flags: <defaults>
</compile_context>

<pallas_src>
import jax
import jax.numpy as jnp
from jax import lax
from jax.experimental import pallas as pl
from jax.experimental.pallas import tpu as pltpu

EPS = 1e-5
# (dh, dw) = (kh-1, kw-1), row-major over the 3x3 kernel positions.
_TAPS = [(dh, dw) for dh in (-1, 0, 1) for dw in (-1, 0, 1)]


def _round_up(x, m):
    return (x + m - 1) // m * m


# ---------------- fused Pallas kernel ----------------

def _make_block_kernel(TM, P1, Cin, Wo, HH, fuse_conv1, cdt):
    """conv1+bn1+relu -> conv2+bn2 -> +shortcut in one grid step.

    fuse_conv1=True  (stride==1): conv1 = 9 shifted dots on a zero-haloed x copy.
    fuse_conv1=False (stride!=1): conv1 consumes JAX-side im2col patches.
    conv2 is always a single wide-K dot against a lane-dense (TM, 9*P1) patch
    scratch built from 9 shifted/masked slabs of the intermediate h.
    """

    def kernel(*refs):
        if fuse_conv1:
            (mask_ref, x_ref, w1_ref, b1_ref, w2_ref, wsc_ref, bias_ref,
             o_ref, xbuf, hbuf, patch) = refs
        else:
            (mask_ref, p1_ref, xs_ref, w1_ref, b1_ref, w2_ref, wsc_ref, bias_ref,
             o_ref, hbuf, patch) = refs

        # Re-zero halo rows every step: only a few vreg stores, and it keeps the
        # kernel correct under "parallel" megacore sharding (scratch is per-core,
        # so a program_id==0-only init would miss the second core).
        hbuf[pl.ds(0, HH), :] = jnp.zeros((HH, P1), cdt)
        hbuf[pl.ds(HH + TM, HH), :] = jnp.zeros((HH, P1), cdt)

        # ---- conv1 (+ folded BN1) + ReLU, f32 accumulation ----
        if fuse_conv1:
            xbuf[pl.ds(0, HH), :] = jnp.zeros((HH, Cin), cdt)
            xbuf[pl.ds(HH + TM, HH), :] = jnp.zeros((HH, Cin), cdt)
            x_tile = x_ref[...]
            xbuf[pl.ds(HH, TM), :] = x_tile
            acc1 = jnp.zeros((TM, P1), jnp.float32)
            for t, (dh, dw) in enumerate(_TAPS):
                xs = xbuf[pl.ds(HH + dh * Wo + dw, TM), :]
                if (dh, dw) != (0, 0):
                    xs = xs * mask_ref[t]          # zero wrapped / cross-image rows
                acc1 = acc1 + jnp.dot(xs, w1_ref[t],
                                      preferred_element_type=jnp.float32)
        else:
            x_tile = xs_ref[...]                   # strided x rows (shortcut input)
            acc1 = jnp.dot(p1_ref[...], w1_ref[...],
                           preferred_element_type=jnp.float32)

        h = jnp.maximum(acc1 + b1_ref[...], 0.0).astype(cdt)
        hbuf[pl.ds(HH, TM), :] = h

        # ---- conv2 patches: 9 shifted, masked slabs -> lane-dense scratch ----
        for t, (dh, dw) in enumerate(_TAPS):
            if (dh, dw) == (0, 0):
                patch[:, pl.ds(t * P1, P1)] = h    # center tap needs no mask
            else:
                hs = hbuf[pl.ds(HH + dh * Wo + dw, TM), :]
                patch[:, pl.ds(t * P1, P1)] = hs * mask_ref[t]

        # ---- conv2 (+ folded BN2) as ONE wide-K MXU dot, shortcut fused ----
        acc = jnp.dot(patch[...], w2_ref[...], preferred_element_type=jnp.float32)
        acc = acc + jnp.dot(x_tile, wsc_ref[...], preferred_element_type=jnp.float32)
        o_ref[...] = (acc + bias_ref[...]).astype(o_ref.dtype)

    return kernel


# ---------------- JAX glue ----------------

def _im2col_3x3(x_nhwc, stride):
    """3x3, padding=1 patches -> (N*Ho*Wo, 9*C), tap-major / channel-minor."""
    N, H, W, C = x_nhwc.shape
    Ho = (H + 2 - 3) // stride + 1
    Wo = (W + 2 - 3) // stride + 1
    xp = jnp.pad(x_nhwc, ((0, 0), (1, 1), (1, 1), (0, 0)))
    cols = []
    for kh in range(3):
        for kw in range(3):
            sl = lax.slice(
                xp, (0, kh, kw, 0),
                (N, kh + (Ho - 1) * stride + 1, kw + (Wo - 1) * stride + 1, C),
                (1, stride, stride, 1))
            cols.append(sl)
    patches = jnp.stack(cols, axis=3)              # (N, Ho, Wo, 9, C)
    return patches.reshape(N * Ho * Wo, 9 * C)


def _bn_fold(gamma, beta, mean, var):
    scale = gamma / jnp.sqrt(var + EPS)
    shift = beta - mean * scale
    return scale.astype(jnp.float32), shift.astype(jnp.float32)


def _choose_images_per_block(n, rows_per_img, bytes_per_row,
                             budget_bytes=20 << 20, max_rows=4096):
    """Images per grid block.

    Rows/block must be a multiple of 16 (bf16 sublane packing). Preference:
    >=2 grid steps (v7x shards the 'parallel' axis over 2 TensorCores), then
    least batch padding, then the largest tile within the VMEM budget.  The
    batch is zero-padded up to a multiple of the returned value.
    """
    best_key, best_ib = None, None
    for ib in range(1, max(2 * n, 16) + 1):
        tm = ib * rows_per_img
        if tm % 16:
            continue
        if best_ib is None:
            best_ib = ib                           # smallest legal tile: fallback
        if tm > max_rows or tm * bytes_per_row > budget_bytes:
            break                                  # tiles only grow from here
        steps = -(-n // ib)
        key = (steps >= 2, -(steps * ib - n), tm)
        if best_key is None or key > best_key:
            best_key, best_ib = key, ib
    assert best_ib is not None, "no legal row tiling found"
    return best_ib


def clsf_block_forward(params, x_nchw, stride=1, compute_dtype=jnp.bfloat16):
    cdt = compute_dtype
    cb = jnp.dtype(cdt).itemsize

    x = jnp.transpose(x_nchw, (0, 2, 3, 1)).astype(jnp.float32)   # NCHW -> NHWC
    N, H, W, Cin = x.shape
    w1, w2 = params["w1"], params["w2"]
    planes, num_classes = w1.shape[0], w2.shape[0]
    Ho = (H + 2 - 3) // stride + 1
    Wo = (W + 2 - 3) // stride + 1
    R = Ho * Wo                                    # output rows per image
    P1 = _round_up(planes, 128)                    # lane-dense intermediate channels
    CP = _round_up(num_classes, 128)               # lane-dense output channels
    fuse_conv1 = (stride == 1)

    # ---- fold BN (eval mode) into the conv weights and a single bias ----
    sc1, sh1 = _bn_fold(**params["bn1"])
    w1m = jnp.transpose(w1, (2, 3, 1, 0)).reshape(9, Cin, planes) * sc1
    w1f = jnp.zeros((9, Cin, P1), jnp.float32).at[:, :, :planes].set(w1m)
    if not fuse_conv1:
        w1f = w1f.reshape(9 * Cin, P1)
    w1f = w1f.astype(cdt)
    b1 = jnp.zeros((1, P1), jnp.float32).at[0, :planes].set(sh1)

    sc2, sh2 = _bn_fold(**params["bn2"])
    w2m = jnp.transpose(w2, (2, 3, 1, 0)).reshape(9, planes, num_classes) * sc2
    w2f = (jnp.zeros((9, P1, CP), jnp.float32)
           .at[:, :planes, :num_classes].set(w2m)
           .reshape(9 * P1, CP).astype(cdt))       # merged-K RHS for one conv2 dot
    bias = jnp.zeros((1, CP), jnp.float32).at[0, :num_classes].set(sh2)

    conv_shortcut = (stride != 1) or (Cin != num_classes)
    if conv_shortcut:
        scs, shs = _bn_fold(**params["bnsc"])
        wscm = params["wsc"].reshape(num_classes, Cin).T * scs[None, :]
        bias = bias.at[0, :num_classes].add(shs)
    else:
        # Identity shortcut as a tiny matmul against an identity embedding, so the
        # residual never needs its own padded HBM stream.
        wscm = jnp.eye(Cin, num_classes, dtype=jnp.float32)
    wscf = jnp.zeros((Cin, CP), jnp.float32).at[:, :num_classes].set(wscm).astype(cdt)

    # ---- choose row tiling / batch padding ----
    # Per-row VMEM estimate: patch scratch + hbuf + xbuf + mask + in/out blocks
    # (narrow arrays are lane-padded to 128 in VMEM) + slop for f32 temporaries.
    bytes_per_row = (9 * P1 + P1 + 3 * 128 + 2 * 9 * 128) * cb + 2 * CP * cb
    bytes_per_row += (2 * P1 + CP) * 4
    if not fuse_conv1:
        bytes_per_row += 2 * _round_up(9 * Cin, 128) * cb
    IB = _choose_images_per_block(N, R, bytes_per_row)
    TM = IB * R
    steps = -(-N // IB)
    Mpad = steps * IB * R
    HH = _round_up(Wo + 1, 16)                     # halo rows >= largest tap offset

    def pad_rows(a):
        return jnp.pad(a, ((0, Mpad - a.shape[0]), (0, 0)))

    # ---- per-block boundary masks (identical for every grid step) ----
    r = jnp.arange(R)
    ho, wo = r // Wo, r % Wo
    m = jnp.stack([(ho + dh >= 0) & (ho + dh < Ho) & (wo + dw >= 0) & (wo + dw < Wo)
                   for dh, dw in _TAPS])                       # (9, R) bools
    mask = (jnp.broadcast_to(m[:, None, :], (9, IB, R))
            .reshape(9, TM, 1).astype(cdt))

    kernel = _make_block_kernel(TM, P1, Cin, Wo, HH, fuse_conv1, cdt)

    const2 = lambda i: (0, 0)
    const3 = lambda i: (0, 0, 0)
    if fuse_conv1:
        inputs = [mask, pad_rows(x.reshape(N * R, Cin)).astype(cdt),
                  w1f, b1, w2f, wscf, bias]
        in_specs = [
            pl.BlockSpec((9, TM, 1), const3),
            pl.BlockSpec((TM, Cin), lambda i: (i, 0)),
            pl.BlockSpec((9, Cin, P1), const3),
            pl.BlockSpec((1, P1), const2),
            pl.BlockSpec((9 * P1, CP), const2),
            pl.BlockSpec((Cin, CP), const2),
            pl.BlockSpec((1, CP), const2),
        ]
        scratch = [pltpu.VMEM((TM + 2 * HH, Cin), cdt),     # x with zero halo
                   pltpu.VMEM((TM + 2 * HH, P1), cdt),      # h with zero halo
                   pltpu.VMEM((TM, 9 * P1), cdt)]           # conv2 im2col patches
    else:
        p1 = _im2col_3x3(x, stride)                          # (N*R, 9*Cin)
        xs_rows = x[:, ::stride, ::stride, :].reshape(N * R, Cin)
        inputs = [mask, pad_rows(p1).astype(cdt), pad_rows(xs_rows).astype(cdt),
                  w1f, b1, w2f, wscf, bias]
        in_specs = [
            pl.BlockSpec((9, TM, 1), const3),
            pl.BlockSpec((TM, 9 * Cin), lambda i: (i, 0)),
            pl.BlockSpec((TM, Cin), lambda i: (i, 0)),
            pl.BlockSpec((9 * Cin, P1), const2),
            pl.BlockSpec((1, P1), const2),
            pl.BlockSpec((9 * P1, CP), const2),
            pl.BlockSpec((Cin, CP), const2),
            pl.BlockSpec((1, CP), const2),
        ]
        scratch = [pltpu.VMEM((TM + 2 * HH, P1), cdt),
                   pltpu.VMEM((TM, 9 * P1), cdt)]

    # Advisory cost (real channel counts) + explicit VMEM budget from the footprint.
    flops = 2 * Mpad * (9 * Cin * planes + 9 * planes * num_classes
                        + Cin * num_classes)
    bytes_in = sum(int(a.size) * a.dtype.itemsize for a in inputs)
    cost = pl.CostEstimate(flops=int(flops), transcendentals=0,
                           bytes_accessed=int(bytes_in + Mpad * CP * cb))
    est_bytes = (TM * bytes_per_row + 4 * HH * (P1 + 128) * cb
                 + 2 * (int(w1f.size) + int(w2f.size) + int(wscf.size)) * cb
                 + (1 << 20))
    vmem_limit = int(min(56 << 20, max(4 * est_bytes, 32 << 20)))

    out = pl.pallas_call(
        kernel,
        out_shape=jax.ShapeDtypeStruct((Mpad, CP), cdt),
        grid_spec=pltpu.PrefetchScalarGridSpec(
            num_scalar_prefetch=0,
            grid=(steps,),
            in_specs=in_specs,
            out_specs=pl.BlockSpec((TM, CP), lambda i: (i, 0)),
            scratch_shapes=scratch,
        ),
        compiler_params=pltpu.CompilerParams(
            dimension_semantics=("parallel",),
            vmem_limit_bytes=vmem_limit),
        cost_estimate=cost,
    )(*inputs)

    out = out[:N * R, :num_classes].reshape(N, Ho, Wo, num_classes)
    return jnp.transpose(out, (0, 3, 1, 2)).astype(jnp.float32)   # back to NCHW


# ---------------- deterministic parameter init ----------------

def make_params(key, in_planes, planes, num_classes):
    ks = jax.random.split(key, 15)

    def bn_params(kg, kb, km, kv, c):
        return dict(
            gamma=1.0 + 0.1 * jax.random.normal(kg, (c,), jnp.float32),
            beta=0.1 * jax.random.normal(kb, (c,), jnp.float32),
            mean=0.1 * jax.random.normal(km, (c,), jnp.float32),
            var=1.0 + 0.1 * jnp.abs(jax.random.normal(kv, (c,), jnp.float32)),
        )

    return dict(
        w1=0.1 * jax.random.normal(ks[0], (planes, in_planes, 3, 3), jnp.float32),
        w2=0.1 * jax.random.normal(ks[1], (num_classes, planes, 3, 3), jnp.float32),
        # Stand-in for generate_cube_random(64, 100): a deterministic fixed
        # (non-trainable) 1x1 shortcut weight of shape (num_classes, in_planes, 1, 1).
        wsc=0.1 * jax.random.normal(ks[2], (num_classes, in_planes, 1, 1), jnp.float32),
        bn1=bn_params(ks[3], ks[4], ks[5], ks[6], planes),
        bn2=bn_params(ks[7], ks[8], ks[9], ks[10], num_classes),
        bnsc=bn_params(ks[11], ks[12], ks[13], ks[14], num_classes),
    )


# ---------------- pure-JAX reference for correctness check ----------------

def reference_forward(params, x_nchw, stride):
    def conv(x, w, s, pad):
        return lax.conv_general_dilated(
            x, w, (s, s), ((pad, pad), (pad, pad)),
            dimension_numbers=("NCHW", "OIHW", "NCHW"))

    def bn(x, p):
        sc = p["gamma"] / jnp.sqrt(p["var"] + EPS)
        sh = p["beta"] - p["mean"] * sc
        return x * sc[None, :, None, None] + sh[None, :, None, None]

    in_planes = x_nchw.shape[1]
    num_classes = params["w2"].shape[0]
    out = jax.nn.relu(bn(conv(x_nchw, params["w1"], stride, 1), params["bn1"]))
    out = bn(conv(out, params["w2"], 1, 1), params["bn2"])
    if stride != 1 or in_planes != num_classes:
        sc_path = bn(conv(x_nchw, params["wsc"], stride, 0), params["bnsc"])
    else:
        sc_path = x_nchw
    return out + sc_path


if __name__ == "__main__":
    key = jax.random.PRNGKey(0)
    # ClsfBlock(in_planes=8, planes=8, stride=1, num_classes=16, option='G', groups=1)
    N, in_planes, H, W = 2, 8, 8, 8
    planes, num_classes = 8, 16

    pkey, xkey = jax.random.split(key)
    params = make_params(pkey, in_planes, planes, num_classes)
    x = jax.random.normal(xkey, (N, in_planes, H, W), jnp.float32)

    # --- stride=1: fully fused path (conv1 im2col done in-kernel) ---
    ref1 = reference_forward(params, x, stride=1)

    out_f32 = jax.block_until_ready(jax.jit(
        lambda p, xx: clsf_block_forward(p, xx, stride=1,
                                         compute_dtype=jnp.float32))(params, x))
    assert out_f32.shape == ref1.shape == (N, num_classes, H, W)
    err_f32 = float(jnp.max(jnp.abs(out_f32 - ref1)))
    assert err_f32 < 1e-4, f"stride=1 f32 max abs err {err_f32}"

    out_bf16 = jax.block_until_ready(jax.jit(
        lambda p, xx: clsf_block_forward(p, xx, stride=1,
                                         compute_dtype=jnp.bfloat16))(params, x))
    err_bf16 = float(jnp.max(jnp.abs(out_bf16 - ref1)))
    assert err_bf16 < 1e-1, f"stride=1 bf16 max abs err {err_bf16}"

    # --- stride=2: conv1 via JAX-side im2col; conv2 / shortcut still fused ---
    ref2 = reference_forward(params, x, stride=2)
    out_s2 = jax.block_until_ready(jax.jit(
        lambda p, xx: clsf_block_forward(p, xx, stride=2,
                                         compute_dtype=jnp.float32))(params, x))
    assert out_s2.shape == ref2.shape == (N, num_classes, H // 2, W // 2)
    err_s2 = float(jnp.max(jnp.abs(out_s2 - ref2)))
    assert err_s2 < 1e-4, f"stride=2 f32 max abs err {err_s2}"

    print("KERNEL_OK")
</pallas_src>

<mosaic_0001>
module attributes {stable_mosaic.version = 11 : i64} {
  func.func @kernel(%arg0: i32, %arg1: memref<9x64x1xf32, #tpu.memory_space<vmem>>, %arg2: memref<64x8xf32, #tpu.memory_space<vmem>>, %arg3: memref<9x8x128xf32, #tpu.memory_space<vmem>>, %arg4: memref<1x128xf32, #tpu.memory_space<vmem>>, %arg5: memref<1152x128xf32, #tpu.memory_space<vmem>>, %arg6: memref<8x128xf32, #tpu.memory_space<vmem>>, %arg7: memref<1x128xf32, #tpu.memory_space<vmem>>, %arg8: memref<64x128xf32, #tpu.memory_space<vmem>>, %arg9: memref<96x8xf32, #tpu.memory_space<vmem>>, %arg10: memref<96x128xf32, #tpu.memory_space<vmem>>, %arg11: memref<64x1152xf32, #tpu.memory_space<vmem>>) attributes {dimension_semantics = [#tpu.dimension_semantics<parallel>], iteration_bounds = array<i64: 2>, scalar_prefetch = 0 : i64, scratch_operands = 3 : i64, tpu.core_type = #tpu.core_type<tc>, window_params = [{pipeline_mode = #tpu.pipeline_mode<synchronous>, transform_indices = @transform_0, window_bounds = array<i64: 9, 64, 1>}, {transform_indices = @transform_1, window_bounds = array<i64: 64, 8>}, {pipeline_mode = #tpu.pipeline_mode<synchronous>, transform_indices = @transform_2, window_bounds = array<i64: 9, 8, 128>}, {pipeline_mode = #tpu.pipeline_mode<synchronous>, transform_indices = @transform_3, window_bounds = array<i64: 1, 128>}, {pipeline_mode = #tpu.pipeline_mode<synchronous>, transform_indices = @transform_4, window_bounds = array<i64: 1152, 128>}, {pipeline_mode = #tpu.pipeline_mode<synchronous>, transform_indices = @transform_5, window_bounds = array<i64: 8, 128>}, {pipeline_mode = #tpu.pipeline_mode<synchronous>, transform_indices = @transform_6, window_bounds = array<i64: 1, 128>}, {transform_indices = @transform_7, window_bounds = array<i64: 64, 128>}]} {
    %cst = arith.constant 0.000000e+00 : f32
    %0 = vector.broadcast %cst : f32 to vector<16x128xf32>
    %c0 = arith.constant 0 : index
    %c0_0 = arith.constant 0 : index
    %1 = vector.load %arg10[%c0, %c0_0] : memref<96x128xf32, #tpu.memory_space<vmem>>, vector<16x128xf32>
    tpu.vector_store %arg10[%c0, %c0_0], %0 {strides = array<i32>} : memref<96x128xf32, #tpu.memory_space<vmem>>, vector<16x128xf32>,
    %cst_1 = arith.constant 0.000000e+00 : f32
    %2 = vector.broadcast %cst_1 : f32 to vector<16x128xf32>
    %c80 = arith.constant 80 : index
    %c0_2 = arith.constant 0 : index
    %3 = vector.load %arg10[%c80, %c0_2] : memref<96x128xf32, #tpu.memory_space<vmem>>, vector<16x128xf32>
    tpu.vector_store %arg10[%c80, %c0_2], %2 {strides = array<i32>} : memref<96x128xf32, #tpu.memory_space<vmem>>, vector<16x128xf32>,
    %cst_3 = arith.constant 0.000000e+00 : f32
    %4 = vector.broadcast %cst_3 : f32 to vector<16x8xf32>
    %c0_4 = arith.constant 0 : index
    %c0_5 = arith.constant 0 : index
    %5 = vector.load %arg9[%c0_4, %c0_5] : memref<96x8xf32, #tpu.memory_space<vmem>>, vector<16x8xf32>
    tpu.vector_store %arg9[%c0_4, %c0_5], %4 {strides = array<i32>} : memref<96x8xf32, #tpu.memory_space<vmem>>, vector<16x8xf32>,
    %cst_6 = arith.constant 0.000000e+00 : f32
    %6 = vector.broadcast %cst_6 : f32 to vector<16x8xf32>
    %c80_7 = arith.constant 80 : index
    %c0_8 = arith.constant 0 : index
    %7 = vector.load %arg9[%c80_7, %c0_8] : memref<96x8xf32, #tpu.memory_space<vmem>>, vector<16x8xf32>
    tpu.vector_store %arg9[%c80_7, %c0_8], %6 {strides = array<i32>} : memref<96x8xf32, #tpu.memory_space<vmem>>, vector<16x8xf32>,
    %c0_9 = arith.constant 0 : index
    %c0_10 = arith.constant 0 : index
    %8 = vector.load %arg2[%c0_9, %c0_10] : memref<64x8xf32, #tpu.memory_space<vmem>>, vector<64x8xf32>
    %c16 = arith.constant 16 : index
    %c0_11 = arith.constant 0 : index
    %9 = vector.load %arg9[%c16, %c0_11] : memref<96x8xf32, #tpu.memory_space<vmem>>, vector<64x8xf32>
    tpu.vector_store %arg9[%c16, %c0_11], %8 {strides = array<i32>} : memref<96x8xf32, #tpu.memory_space<vmem>>, vector<64x8xf32>,
    %cst_12 = arith.constant 0.000000e+00 : f32
    %10 = vector.broadcast %cst_12 : f32 to vector<64x128xf32>
    %c7 = arith.constant 7 : index
    %c0_13 = arith.constant 0 : index
    %11 = vector.load %arg9[%c7, %c0_13] : memref<96x8xf32, #tpu.memory_space<vmem>>, vector<64x8xf32>
    %c0_14 = arith.constant 0 : index
    %c0_15 = arith.constant 0 : index
    %c0_16 = arith.constant 0 : index
    %12 = vector.load %arg1[%c0_14, %c0_15, %c0_16] : memref<9x64x1xf32, #tpu.memory_space<vmem>>, vector<1x64x1xf32>
    %13 = vector.shape_cast %12 : vector<1x64x1xf32> to vector<64x1xf32>
    %14 = vector.broadcast %13 : vector<64x1xf32> to vector<64x8xf32>
    %15 = arith.mulf %11, %14 : vector<64x8xf32>
    %c0_17 = arith.constant 0 : index
    %c0_18 = arith.constant 0 : index
    %c0_19 = arith.constant 0 : index
    %16 = vector.load %arg3[%c0_17, %c0_18, %c0_19] : memref<9x8x128xf32, #tpu.memory_space<vmem>>, vector<1x8x128xf32>
    %17 = vector.shape_cast %16 : vector<1x8x128xf32> to vector<8x128xf32>
    %cst_20 = arith.constant dense<0.000000e+00> : vector<64x128xf32>
    %18 = tpu.matmul %15, %17, %cst_20 {dimension_numbers = #tpu.dot_dimension_numbers<[1], [0], [0], [1], [0, 0, 1, 1], [], []>} : vector<64x8xf32>, vector<8x128xf32>, vector<64x128xf32> -> vector<64x128xf32>
    %19 = arith.addf %10, %18 : vector<64x128xf32>
    %c8 = arith.constant 8 : index
    %c0_21 = arith.constant 0 : index
    %20 = vector.load %arg9[%c8, %c0_21] : memref<96x8xf32, #tpu.memory_space<vmem>>, vector<64x8xf32>
    %c1 = arith.constant 1 : index
    %c0_22 = arith.constant 0 : index
    %c0_23 = arith.constant 0 : index
    %21 = vector.load %arg1[%c1, %c0_22, %c0_23] : memref<9x64x1xf32, #tpu.memory_space<vmem>>, vector<1x64x1xf32>
    %22 = vector.shape_cast %21 : vector<1x64x1xf32> to vector<64x1xf32>
    %23 = vector.broadcast %22 : vector<64x1xf32> to vector<64x8xf32>
    %24 = arith.mulf %20, %23 : vector<64x8xf32>
    %c1_24 = arith.constant 1 : index
    %c0_25 = arith.constant 0 : index
    %c0_26 = arith.constant 0 : index
    %25 = vector.load %arg3[%c1_24, %c0_25, %c0_26] : memref<9x8x128xf32, #tpu.memory_space<vmem>>, vector<1x8x128xf32>
    %26 = vector.shape_cast %25 : vector<1x8x128xf32> to vector<8x128xf32>
    %cst_27 = arith.constant dense<0.000000e+00> : vector<64x128xf32>
    %27 = tpu.matmul %24, %26, %cst_27 {dimension_numbers = #tpu.dot_dimension_numbers<[1], [0], [0], [1], [0, 0, 1, 1], [], []>} : vector<64x8xf32>, vector<8x128xf32>, vector<64x128xf32> -> vector<64x128xf32>
    %28 = arith.addf %19, %27 : vector<64x128xf32>
    %c9 = arith.constant 9 : index
    %c0_28 = arith.constant 0 : index
    %29 = vector.load %arg9[%c9, %c0_28] : memref<96x8xf32, #tpu.memory_space<vmem>>, vector<64x8xf32>
    %c2 = arith.constant 2 : index
    %c0_29 = arith.constant 0 : index
    %c0_30 = arith.constant 0 : index
    %30 = vector.load %arg1[%c2, %c0_29, %c0_30] : memref<9x64x1xf32, #tpu.memory_space<vmem>>, vector<1x64x1xf32>
    %31 = vector.shape_cast %30 : vector<1x64x1xf32> to vector<64x1xf32>
    %32 = vector.broadcast %31 : vector<64x1xf32> to vector<64x8xf32>
    %33 = arith.mulf %29, %32 : vector<64x8xf32>
    %c2_31 = arith.constant 2 : index
    %c0_32 = arith.constant 0 : index
    %c0_33 = arith.constant 0 : index
    %34 = vector.load %arg3[%c2_31, %c0_32, %c0_33] : memref<9x8x128xf32, #tpu.memory_space<vmem>>, vector<1x8x128xf32>
    %35 = vector.shape_cast %34 : vector<1x8x128xf32> to vector<8x128xf32>
    %cst_34 = arith.constant dense<0.000000e+00> : vector<64x128xf32>
    %36 = tpu.matmul %33, %35, %cst_34 {dimension_numbers = #tpu.dot_dimension_numbers<[1], [0], [0], [1], [0, 0, 1, 1], [], []>} : vector<64x8xf32>, vector<8x128xf32>, vector<64x128xf32> -> vector<64x128xf32>
    %37 = arith.addf %28, %36 : vector<64x128xf32>
    %c15 = arith.constant 15 : index
    %c0_35 = arith.constant 0 : index
    %38 = vector.load %arg9[%c15, %c0_35] : memref<96x8xf32, #tpu.memory_space<vmem>>, vector<64x8xf32>
    %c3 = arith.constant 3 : index
    %c0_36 = arith.constant 0 : index
    %c0_37 = arith.constant 0 : index
    %39 = vector.load %arg1[%c3, %c0_36, %c0_37] : memref<9x64x1xf32, #tpu.memory_space<vmem>>, vector<1x64x1xf32>
    %40 = vector.shape_cast %39 : vector<1x64x1xf32> to vector<64x1xf32>
    %41 = vector.broadcast %40 : vector<64x1xf32> to vector<64x8xf32>
    %42 = arith.mulf %38, %41 : vector<64x8xf32>
    %c3_38 = arith.constant 3 : index
    %c0_39 = arith.constant 0 : index
    %c0_40 = arith.constant 0 : index
    %43 = vector.load %arg3[%c3_38, %c0_39, %c0_40] : memref<9x8x128xf32, #tpu.memory_space<vmem>>, vector<1x8x128xf32>
    %44 = vector.shape_cast %43 : vector<1x8x128xf32> to vector<8x128xf32>
    %cst_41 = arith.constant dense<0.000000e+00> : vector<64x128xf32>
    %45 = tpu.matmul %42, %44, %cst_41 {dimension_numbers = #tpu.dot_dimension_numbers<[1], [0], [0], [1], [0, 0, 1, 1], [], []>} : vector<64x8xf32>, vector<8x128xf32>, vector<64x128xf32> -> vector<64x128xf32>
    %46 = arith.addf %37, %45 : vector<64x128xf32>
    %c16_42 = arith.constant 16 : index
    %c0_43 = arith.constant 0 : index
    %47 = vector.load %arg9[%c16_42, %c0_43] : memref<96x8xf32, #tpu.memory_space<vmem>>, vector<64x8xf32>
    %c4 = arith.constant 4 : index
    %c0_44 = arith.constant 0 : index
    %c0_45 = arith.constant 0 : index
    %48 = vector.load %arg3[%c4, %c0_44, %c0_45] : memref<9x8x128xf32, #tpu.memory_space<vmem>>, vector<1x8x128xf32>
    %49 = vector.shape_cast %48 : vector<1x8x128xf32> to vector<8x128xf32>
    %cst_46 = arith.constant dense<0.000000e+00> : vector<64x128xf32>
    %50 = tpu.matmul %47, %49, %cst_46 {dimension_numbers = #tpu.dot_dimension_numbers<[1], [0], [0], [1], [0, 0, 1, 1], [], []>} : vector<64x8xf32>, vector<8x128xf32>, vector<64x128xf32> -> vector<64x128xf32>
    %51 = arith.addf %46, %50 : vector<64x128xf32>
    %c17 = arith.constant 17 : index
    %c0_47 = arith.constant 0 : index
    %52 = vector.load %arg9[%c17, %c0_47] : memref<96x8xf32, #tpu.memory_space<vmem>>, vector<64x8xf32>
    %c5 = arith.constant 5 : index
    %c0_48 = arith.constant 0 : index
    %c0_49 = arith.constant 0 : index
    %53 = vector.load %arg1[%c5, %c0_48, %c0_49] : memref<9x64x1xf32, #tpu.memory_space<vmem>>, vector<1x64x1xf32>
    %54 = vector.shape_cast %53 : vector<1x64x1xf32> to vector<64x1xf32>
    %55 = vector.broadcast %54 : vector<64x1xf32> to vector<64x8xf32>
    %56 = arith.mulf %52, %55 : vector<64x8xf32>
    %c5_50 = arith.constant 5 : index
    %c0_51 = arith.constant 0 : index
    %c0_52 = arith.constant 0 : index
    %57 = vector.load %arg3[%c5_50, %c0_51, %c0_52] : memref<9x8x128xf32, #tpu.memory_space<vmem>>, vector<1x8x128xf32>
    %58 = vector.shape_cast %57 : vector<1x8x128xf32> to vector<8x128xf32>
    %cst_53 = arith.constant dense<0.000000e+00> : vector<64x128xf32>
    %59 = tpu.matmul %56, %58, %cst_53 {dimension_numbers = #tpu.dot_dimension_numbers<[1], [0], [0], [1], [0, 0, 1, 1], [], []>} : vector<64x8xf32>, vector<8x128xf32>, vector<64x128xf32> -> vector<64x128xf32>
    %60 = arith.addf %51, %59 : vector<64x128xf32>
    %c23 = arith.constant 23 : index
    %c0_54 = arith.constant 0 : index
    %61 = vector.load %arg9[%c23, %c0_54] : memref<96x8xf32, #tpu.memory_space<vmem>>, vector<64x8xf32>
    %c6 = arith.constant 6 : index
    %c0_55 = arith.constant 0 : index
    %c0_56 = arith.constant 0 : index
    %62 = vector.load %arg1[%c6, %c0_55, %c0_56] : memref<9x64x1xf32, #tpu.memory_space<vmem>>, vector<1x64x1xf32>
    %63 = vector.shape_cast %62 : vector<1x64x1xf32> to vector<64x1xf32>
    %64 = vector.broadcast %63 : vector<64x1xf32> to vector<64x8xf32>
    %65 = arith.mulf %61, %64 : vector<64x8xf32>
    %c6_57 = arith.constant 6 : index
    %c0_58 = arith.constant 0 : index
    %c0_59 = arith.constant 0 : index
    %66 = vector.load %arg3[%c6_57, %c0_58, %c0_59] : memref<9x8x128xf32, #tpu.memory_space<vmem>>, vector<1x8x128xf32>
    %67 = vector.shape_cast %66 : vector<1x8x128xf32> to vector<8x128xf32>
    %cst_60 = arith.constant dense<0.000000e+00> : vector<64x128xf32>
    %68 = tpu.matmul %65, %67, %cst_60 {dimension_numbers = #tpu.dot_dimension_numbers<[1], [0], [0], [1], [0, 0, 1, 1], [], []>} : vector<64x8xf32>, vector<8x128xf32>, vector<64x128xf32> -> vector<64x128xf32>
    %69 = arith.addf %60, %68 : vector<64x128xf32>
    %c24 = arith.constant 24 : index
    %c0_61 = arith.constant 0 : index
    %70 = vector.load %arg9[%c24, %c0_61] : memref<96x8xf32, #tpu.memory_space<vmem>>, vector<64x8xf32>
    %c7_62 = arith.constant 7 : index
    %c0_63 = arith.constant 0 : index
    %c0_64 = arith.constant 0 : index
    %71 = vector.load %arg1[%c7_62, %c0_63, %c0_64] : memref<9x64x1xf32, #tpu.memory_space<vmem>>, vector<1x64x1xf32>
    %72 = vector.shape_cast %71 : vector<1x64x1xf32> to vector<64x1xf32>
    %73 = vector.broadcast %72 : vector<64x1xf32> to vector<64x8xf32>
    %74 = arith.mulf %70, %73 : vector<64x8xf32>
    %c7_65 = arith.constant 7 : index
    %c0_66 = arith.constant 0 : index
    %c0_67 = arith.constant 0 : index
    %75 = vector.load %arg3[%c7_65, %c0_66, %c0_67] : memref<9x8x128xf32, #tpu.memory_space<vmem>>, vector<1x8x128xf32>
    %76 = vector.shape_cast %75 : vector<1x8x128xf32> to vector<8x128xf32>
    %cst_68 = arith.constant dense<0.000000e+00> : vector<64x128xf32>
    %77 = tpu.matmul %74, %76, %cst_68 {dimension_numbers = #tpu.dot_dimension_numbers<[1], [0], [0], [1], [0, 0, 1, 1], [], []>} : vector<64x8xf32>, vector<8x128xf32>, vector<64x128xf32> -> vector<64x128xf32>
    %78 = arith.addf %69, %77 : vector<64x128xf32>
    %c25 = arith.constant 25 : index
    %c0_69 = arith.constant 0 : index
    %79 = vector.load %arg9[%c25, %c0_69] : memref<96x8xf32, #tpu.memory_space<vmem>>, vector<64x8xf32>
    %c8_70 = arith.constant 8 : index
    %c0_71 = arith.constant 0 : index
    %c0_72 = arith.constant 0 : index
    %80 = vector.load %arg1[%c8_70, %c0_71, %c0_72] : memref<9x64x1xf32, #tpu.memory_space<vmem>>, vector<1x64x1xf32>
    %81 = vector.shape_cast %80 : vector<1x64x1xf32> to vector<64x1xf32>
    %82 = vector.broadcast %81 : vector<64x1xf32> to vector<64x8xf32>
    %83 = arith.mulf %79, %82 : vector<64x8xf32>
    %c8_73 = arith.constant 8 : index
    %c0_74 = arith.constant 0 : index
    %c0_75 = arith.constant 0 : index
    %84 = vector.load %arg3[%c8_73, %c0_74, %c0_75] : memref<9x8x128xf32, #tpu.memory_space<vmem>>, vector<1x8x128xf32>
    %85 = vector.shape_cast %84 : vector<1x8x128xf32> to vector<8x128xf32>
    %cst_76 = arith.constant dense<0.000000e+00> : vector<64x128xf32>
    %86 = tpu.matmul %83, %85, %cst_76 {dimension_numbers = #tpu.dot_dimension_numbers<[1], [0], [0], [1], [0, 0, 1, 1], [], []>} : vector<64x8xf32>, vector<8x128xf32>, vector<64x128xf32> -> vector<64x128xf32>
    %87 = arith.addf %78, %86 : vector<64x128xf32>
    %c0_77 = arith.constant 0 : index
    %c0_78 = arith.constant 0 : index
    %88 = vector.load %arg4[%c0_77, %c0_78] : memref<1x128xf32, #tpu.memory_space<vmem>>, vector<1x128xf32>
    %89 = vector.broadcast %88 : vector<1x128xf32> to vector<64x128xf32>
    %90 = arith.addf %87, %89 : vector<64x128xf32>
    %cst_79 = arith.constant 0.000000e+00 : f32
    %91 = vector.broadcast %cst_79 : f32 to vector<64x128xf32>
    %92 = arith.maximumf %90, %91 : vector<64x128xf32>
    %c16_80 = arith.constant 16 : index
    %c0_81 = arith.constant 0 : index
    %93 = vector.load %arg10[%c16_80, %c0_81] : memref<96x128xf32, #tpu.memory_space<vmem>>, vector<64x128xf32>
    tpu.vector_store %arg10[%c16_80, %c0_81], %92 {strides = array<i32>} : memref<96x128xf32, #tpu.memory_space<vmem>>, vector<64x128xf32>,
    %c7_82 = arith.constant 7 : index
    %c0_83 = arith.constant 0 : index
    %94 = vector.load %arg10[%c7_82, %c0_83] : memref<96x128xf32, #tpu.memory_space<vmem>>, vector<64x128xf32>
    %c0_84 = arith.constant 0 : index
    %c0_85 = arith.constant 0 : index
    %c0_86 = arith.constant 0 : index
    %95 = vector.load %arg1[%c0_84, %c0_85, %c0_86] : memref<9x64x1xf32, #tpu.memory_space<vmem>>, vector<1x64x1xf32>
    %96 = vector.shape_cast %95 : vector<1x64x1xf32> to vector<64x1xf32>
    %97 = vector.broadcast %96 : vector<64x1xf32> to vector<64x128xf32>
    %98 = arith.mulf %94, %97 : vector<64x128xf32>
    %c0_87 = arith.constant 0 : index
    %c0_88 = arith.constant 0 : index
    %99 = vector.load %arg11[%c0_87, %c0_88] : memref<64x1152xf32, #tpu.memory_space<vmem>>, vector<64x128xf32>
    tpu.vector_store %arg11[%c0_87, %c0_88], %98 {strides = array<i32>} : memref<64x1152xf32, #tpu.memory_space<vmem>>, vector<64x128xf32>,
    %c8_89 = arith.constant 8 : index
    %c0_90 = arith.constant 0 : index
    %100 = vector.load %arg10[%c8_89, %c0_90] : memref<96x128xf32, #tpu.memory_space<vmem>>, vector<64x128xf32>
    %c1_91 = arith.constant 1 : index
    %c0_92 = arith.constant 0 : index
    %c0_93 = arith.constant 0 : index
    %101 = vector.load %arg1[%c1_91, %c0_92, %c0_93] : memref<9x64x1xf32, #tpu.memory_space<vmem>>, vector<1x64x1xf32>
    %102 = vector.shape_cast %101 : vector<1x64x1xf32> to vector<64x1xf32>
    %103 = vector.broadcast %102 : vector<64x1xf32> to vector<64x128xf32>
    %104 = arith.mulf %100, %103 : vector<64x128xf32>
    %c0_94 = arith.constant 0 : index
    %c128 = arith.constant 128 : index
    %105 = vector.load %arg11[%c0_94, %c128] : memref<64x1152xf32, #tpu.memory_space<vmem>>, vector<64x128xf32>
    tpu.vector_store %arg11[%c0_94, %c128], %104 {strides = array<i32>} : memref<64x1152xf32, #tpu.memory_space<vmem>>, vector<64x128xf32>,
    %c9_95 = arith.constant 9 : index
    %c0_96 = arith.constant 0 : index
    %106 = vector.load %arg10[%c9_95, %c0_96] : memref<96x128xf32, #tpu.memory_space<vmem>>, vector<64x128xf32>
    %c2_97 = arith.constant 2 : index
    %c0_98 = arith.constant 0 : index
    %c0_99 = arith.constant 0 : index
    %107 = vector.load %arg1[%c2_97, %c0_98, %c0_99] : memref<9x64x1xf32, #tpu.memory_space<vmem>>, vector<1x64x1xf32>
    %108 = vector.shape_cast %107 : vector<1x64x1xf32> to vector<64x1xf32>
    %109 = vector.broadcast %108 : vector<64x1xf32> to vector<64x128xf32>
    %110 = arith.mulf %106, %109 : vector<64x128xf32>
    %c0_100 = arith.constant 0 : index
    %c256 = arith.constant 256 : index
    %111 = vector.load %arg11[%c0_100, %c256] : memref<64x1152xf32, #tpu.memory_space<vmem>>, vector<64x128xf32>
    tpu.vector_store %arg11[%c0_100, %c256], %110 {strides = array<i32>} : memref<64x1152xf32, #tpu.memory_space<vmem>>, vector<64x128xf32>,
    %c15_101 = arith.constant 15 : index
    %c0_102 = arith.constant 0 : index
    %112 = vector.load %arg10[%c15_101, %c0_102] : memref<96x128xf32, #tpu.memory_space<vmem>>, vector<64x128xf32>
    %c3_103 = arith.constant 3 : index
    %c0_104 = arith.constant 0 : index
    %c0_105 = arith.constant 0 : index
    %113 = vector.load %arg1[%c3_103, %c0_104, %c0_105] : memref<9x64x1xf32, #tpu.memory_space<vmem>>, vector<1x64x1xf32>
    %114 = vector.shape_cast %113 : vector<1x64x1xf32> to vector<64x1xf32>
    %115 = vector.broadcast %114 : vector<64x1xf32> to vector<64x128xf32>
    %116 = arith.mulf %112, %115 : vector<64x128xf32>
    %c0_106 = arith.constant 0 : index
    %c384 = arith.constant 384 : index
    %117 = vector.load %arg11[%c0_106, %c384] : memref<64x1152xf32, #tpu.memory_space<vmem>>, vector<64x128xf32>
    tpu.vector_store %arg11[%c0_106, %c384], %116 {strides = array<i32>} : memref<64x1152xf32, #tpu.memory_space<vmem>>, vector<64x128xf32>,
    %c0_107 = arith.constant 0 : index
    %c512 = arith.constant 512 : index
    %118 = vector.load %arg11[%c0_107, %c512] : memref<64x1152xf32, #tpu.memory_space<vmem>>, vector<64x128xf32>
    tpu.vector_store %arg11[%c0_107, %c512], %92 {strides = array<i32>} : memref<64x1152xf32, #tpu.memory_space<vmem>>, vector<64x128xf32>,
    %c17_108 = arith.constant 17 : index
    %c0_109 = arith.constant 0 : index
    %119 = vector.load %arg10[%c17_108, %c0_109] : memref<96x128xf32, #tpu.memory_space<vmem>>, vector<64x128xf32>
    %c5_110 = arith.constant 5 : index
    %c0_111 = arith.constant 0 : index
    %c0_112 = arith.constant 0 : index
    %120 = vector.load %arg1[%c5_110, %c0_111, %c0_112] : memref<9x64x1xf32, #tpu.memory_space<vmem>>, vector<1x64x1xf32>
    %121 = vector.shape_cast %120 : vector<1x64x1xf32> to vector<64x1xf32>
    %122 = vector.broadcast %121 : vector<64x1xf32> to vector<64x128xf32>
    %123 = arith.mulf %119, %122 : vector<64x128xf32>
    %c0_113 = arith.constant 0 : index
    %c640 = arith.constant 640 : index
    %124 = vector.load %arg11[%c0_113, %c640] : memref<64x1152xf32, #tpu.memory_space<vmem>>, vector<64x128xf32>
    tpu.vector_store %arg11[%c0_113, %c640], %123 {strides = array<i32>} : memref<64x1152xf32, #tpu.memory_space<vmem>>, vector<64x128xf32>,
    %c23_114 = arith.constant 23 : index
    %c0_115 = arith.constant 0 : index
    %125 = vector.load %arg10[%c23_114, %c0_115] : memref<96x128xf32, #tpu.memory_space<vmem>>, vector<64x128xf32>
    %c6_116 = arith.constant 6 : index
    %c0_117 = arith.constant 0 : index
    %c0_118 = arith.constant 0 : index
    %126 = vector.load %arg1[%c6_116, %c0_117, %c0_118] : memref<9x64x1xf32, #tpu.memory_space<vmem>>, vector<1x64x1xf32>
    %127 = vector.shape_cast %126 : vector<1x64x1xf32> to vector<64x1xf32>
    %128 = vector.broadcast %127 : vector<64x1xf32> to vector<64x128xf32>
    %129 = arith.mulf %125, %128 : vector<64x128xf32>
    %c0_119 = arith.constant 0 : index
    %c768 = arith.constant 768 : index
    %130 = vector.load %arg11[%c0_119, %c768] : memref<64x1152xf32, #tpu.memory_space<vmem>>, vector<64x128xf32>
    tpu.vector_store %arg11[%c0_119, %c768], %129 {strides = array<i32>} : memref<64x1152xf32, #tpu.memory_space<vmem>>, vector<64x128xf32>,
    %c24_120 = arith.constant 24 : index
    %c0_121 = arith.constant 0 : index
    %131 = vector.load %arg10[%c24_120, %c0_121] : memref<96x128xf32, #tpu.memory_space<vmem>>, vector<64x128xf32>
    %c7_122 = arith.constant 7 : index
    %c0_123 = arith.constant 0 : index
    %c0_124 = arith.constant 0 : index
    %132 = vector.load %arg1[%c7_122, %c0_123, %c0_124] : memref<9x64x1xf32, #tpu.memory_space<vmem>>, vector<1x64x1xf32>
    %133 = vector.shape_cast %132 : vector<1x64x1xf32> to vector<64x1xf32>
    %134 = vector.broadcast %133 : vector<64x1xf32> to vector<64x128xf32>
    %135 = arith.mulf %131, %134 : vector<64x128xf32>
    %c0_125 = arith.constant 0 : index
    %c896 = arith.constant 896 : index
    %136 = vector.load %arg11[%c0_125, %c896] : memref<64x1152xf32, #tpu.memory_space<vmem>>, vector<64x128xf32>
    tpu.vector_store %arg11[%c0_125, %c896], %135 {strides = array<i32>} : memref<64x1152xf32, #tpu.memory_space<vmem>>, vector<64x128xf32>,
    %c25_126 = arith.constant 25 : index
    %c0_127 = arith.constant 0 : index
    %137 = vector.load %arg10[%c25_126, %c0_127] : memref<96x128xf32, #tpu.memory_space<vmem>>, vector<64x128xf32>
    %c8_128 = arith.constant 8 : index
    %c0_129 = arith.constant 0 : index
    %c0_130 = arith.constant 0 : index
    %138 = vector.load %arg1[%c8_128, %c0_129, %c0_130] : memref<9x64x1xf32, #tpu.memory_space<vmem>>, vector<1x64x1xf32>
    %139 = vector.shape_cast %138 : vector<1x64x1xf32> to vector<64x1xf32>
    %140 = vector.broadcast %139 : vector<64x1xf32> to vector<64x128xf32>
    %141 = arith.mulf %137, %140 : vector<64x128xf32>
    %c0_131 = arith.constant 0 : index
    %c1024 = arith.constant 1024 : index
    %142 = vector.load %arg11[%c0_131, %c1024] : memref<64x1152xf32, #tpu.memory_space<vmem>>, vector<64x128xf32>
    tpu.vector_store %arg11[%c0_131, %c1024], %141 {strides = array<i32>} : memref<64x1152xf32, #tpu.memory_space<vmem>>, vector<64x128xf32>,
    %c0_132 = arith.constant 0 : index
    %c0_133 = arith.constant 0 : index
    %143 = vector.load %arg11[%c0_132, %c0_133] : memref<64x1152xf32, #tpu.memory_space<vmem>>, vector<64x1152xf32>
    %c0_134 = arith.constant 0 : index
    %c0_135 = arith.constant 0 : index
    %144 = vector.load %arg5[%c0_134, %c0_135] : memref<1152x128xf32, #tpu.memory_space<vmem>>, vector<1152x128xf32>
    %cst_136 = arith.constant dense<0.000000e+00> : vector<64x128xf32>
    %145 = tpu.matmul %143, %144, %cst_136 {dimension_numbers = #tpu.dot_dimension_numbers<[1], [0], [0], [1], [0, 0, 1, 1], [], []>} : vector<64x1152xf32>, vector<1152x128xf32>, vector<64x128xf32> -> vector<64x128xf32>
    %c0_137 = arith.constant 0 : index
    %c0_138 = arith.constant 0 : index
    %146 = vector.load %arg6[%c0_137, %c0_138] : memref<8x128xf32, #tpu.memory_space<vmem>>, vector<8x128xf32>
    %cst_139 = arith.constant dense<0.000000e+00> : vector<64x128xf32>
    %147 = tpu.matmul %8, %146, %cst_139 {dimension_numbers = #tpu.dot_dimension_numbers<[1], [0], [0], [1], [0, 0, 1, 1], [], []>} : vector<64x8xf32>, vector<8x128xf32>, vector<64x128xf32> -> vector<64x128xf32>
    %148 = arith.addf %145, %147 : vector<64x128xf32>
    %c0_140 = arith.constant 0 : index
    %c0_141 = arith.constant 0 : index
    %149 = vector.load %arg7[%c0_140, %c0_141] : memref<1x128xf32, #tpu.memory_space<vmem>>, vector<1x128xf32>
    %150 = vector.broadcast %149 : vector<1x128xf32> to vector<64x128xf32>
    %151 = arith.addf %148, %150 : vector<64x128xf32>
    %c0_142 = arith.constant 0 : index
    %c0_143 = arith.constant 0 : index
    %152 = vector.load %arg8[%c0_142, %c0_143] : memref<64x128xf32, #tpu.memory_space<vmem>>, vector<64x128xf32>
    tpu.vector_store %arg8[%c0_142, %c0_143], %151 {strides = array<i32>} : memref<64x128xf32, #tpu.memory_space<vmem>>, vector<64x128xf32>,
    return
  }
  func.func @transform_0(%arg0: i32) -> (i32, i32, i32) {
    %c0_i32 = arith.constant 0 : i32
    %c0_i32_0 = arith.constant 0 : i32
    %c0_i32_1 = arith.constant 0 : i32
    %c0_i32_2 = arith.constant 0 : i32
    return %c0_i32, %c0_i32_0, %c0_i32_1 : i32, i32, i32
  }
  func.func @transform_1(%arg0: i32) -> (i32, i32) {
    %c0_i32 = arith.constant 0 : i32
    %c0_i32_0 = arith.constant 0 : i32
    return %arg0, %c0_i32 : i32, i32
  }
  func.func @transform_2(%arg0: i32) -> (i32, i32, i32) {
    %c0_i32 = arith.constant 0 : i32
    %c0_i32_0 = arith.constant 0 : i32
    %c0_i32_1 = arith.constant 0 : i32
    %c0_i32_2 = arith.constant 0 : i32
    return %c0_i32, %c0_i32_0, %c0_i32_1 : i32, i32, i32
  }
  func.func @transform_3(%arg0: i32) -> (i32, i32) {
    %c0_i32 = arith.constant 0 : i32
    %c0_i32_0 = arith.constant 0 : i32
    %c0_i32_1 = arith.constant 0 : i32
    return %c0_i32, %c0_i32_0 : i32, i32
  }
  func.func @transform_4(%arg0: i32) -> (i32, i32) {
    %c0_i32 = arith.constant 0 : i32
    %c0_i32_0 = arith.constant 0 : i32
    %c0_i32_1 = arith.constant 0 : i32
    return %c0_i32, %c0_i32_0 : i32, i32
  }
  func.func @transform_5(%arg0: i32) -> (i32, i32) {
    %c0_i32 = arith.constant 0 : i32
    %c0_i32_0 = arith.constant 0 : i32
    %c0_i32_1 = arith.constant 0 : i32
    return %c0_i32, %c0_i32_0 : i32, i32
  }
  func.func @transform_6(%arg0: i32) -> (i32, i32) {
    %c0_i32 = arith.constant 0 : i32
    %c0_i32_0 = arith.constant 0 : i32
    %c0_i32_1 = arith.constant 0 : i32
    return %c0_i32, %c0_i32_0 : i32, i32
  }
  func.func @transform_7(%arg0: i32) -> (i32, i32) {
    %c0_i32 = arith.constant 0 : i32
    %c0_i32_0 = arith.constant 0 : i32
    return %arg0, %c0_i32 : i32, i32
  }
}

</mosaic_0001>

<bundles_post_ra>
// kernel: _lambda_.1
= control target key start
LH: loop header
LB: loop body
LE: loop exit
PB: predicated region body
PF: predicated region fallthrough
CT: control target
= control target key end

     0   :  { %12 = vsyncpa [#allocation6], 0  ;;  %s6444_s0 = inlined_call_operand.vmem [shape: f32[9,64,1], index: 0, kind: input, shape index: {}]   ;;  %s6445_s1 = inlined_call_operand.vmem [shape: f32[128,8], index: 1, kind: input, shape index: {}]   ;;  %s6446_s2 = inlined_call_operand.vmem [shape: f32[9,8,128], index: 2, kind: input, shape index: {}]   ;;  %s6447_s3 = inlined_call_operand.vmem [shape: f32[1,128], index: 3, kind: input, shape index: {}]   ;;  %s6448_s4 = inlined_call_operand.vmem [shape: f32[1152,128], index: 4, kind: input, shape index: {}]   ;;  %s6449_s5 = inlined_call_operand.vmem [shape: f32[8,128], index: 5, kind: input, shape index: {}]   ;;  %s6450_s6 = inlined_call_operand.vmem [shape: f32[1,128], index: 6, kind: input, shape index: {}]   ;;  %s6451_s7 = inlined_call_operand.hbm [shape: f32[128,128], index: 7, kind: output, shape index: {}]  }
   0x1   :  { %14 = vsyncpa [#allocation6 + $0x1], 0  ;;  %s4823_s24 = smov 0   ;;  %s4825_s25 = smov 0  }
   0x2   :  { %s4827_s26 = smov 0   ;;  %s4829_s27 = smov 0  }
   0x3 LB: > { %s4844_s28 = sadd.s32 4294967295, %s4776_s27   ;;  %s3651_s29 = sadd.s32 4294967294, %s4776_s27   ;;  %s4776_s27 = sphi %s4829_s27, %s6517_s27   ;;  %s4772_s26 = sphi %s4827_s26, %s6516_s26   ;;  %s4768_s25 = sphi %s4825_s25, %s6515_s25   ;;  %s4764_s24 = sphi %s4823_s24, %s6514_s24  }
   0x4   : > { %s4848_s30 = sadd.s32 1, %s4776_s27   ;;  %s179_s8 = sadd.s32 1, %s4772_s26 }
   0x5   : > { %s176_s9 = ssub.s32 %s4776_s27, %s4848_s30  ;;  %p189_p0 = scmp.ne.s32.totalorder %s4772_s26, %s4768_s25 }
   0x6   : > { %p177_p1 = scmp.eq.s32.totalorder %s176_s9, 0  ;;  %p190_p2 = scmp.eq.s32.totalorder %s4844_s28, 1 }
   0x7   : > { %p195_p3 = scmp.ne.s32.totalorder %s4768_s25, %s4764_s24  ;;  %p196_p4 = scmp.eq.s32.totalorder %s3651_s29, 1 }
   0x8   : > { %s4859_s10 = scalar_select %p177_p1, %s4772_s26, %s179_s8  }
   0x9   : > { %p4861_p5 = por %p190_p2, %p189_p0  ;;  %p4865_p6 = por %p196_p4, %p195_p3 }
   0xa   : > { %p3654_p7 = scmp.ge.s32.totalorder %s4776_s27, 1  ;;  %p241_p8 = scmp.lt.s32.totalorder %s4776_s27, 3 }
   0xc   : > { %p242_p9 = pnand %p3654_p7, %p241_p8 }
   0xe   : > { %245 = sbr.rel (%p242_p9) target bundleno = 872 (0x368), region = 48 }
  0x15   : > { %v4874_v0 = vld [vmem:[%s6444_s0 + $0x50] sm:$0xff]  ;;  %v4879_v1 = vld [vmem:[%s6444_s0 + $0x40] sm:$0xff]  ;;  %vm284_vm0 = vcmask 64512   ;;  %v4778_v2 = vmov 0   ;;  %v4779_v3 = vmov 0.0   ;;  %v4890_v4 = vld [vmem:[%s6444_s0 + $0x58] sm:$0xff] }
  0x16   : > { %4712 = vset.pattern.permute.xlu1 %v4778_v2  ;;  %4711 = vset.pattern.permute.xlu0 %v4778_v2  ;;  %286 = vst.msk [vmem:[#allocation2 + $0x8] sm:$0xff] %vm284_vm0, %v4779_v3  ;;  %280 = vst [vmem:[#allocation3] sm:$0xff] %v4779_v3  ;;  %v4895_v5 = vld [vmem:[%s6444_s0 + $0x48] sm:$0xff]  ;;  %s3656_s21 = sshll.u32 %s4844_s28, 3  ;;  %v4908_v7 = vld [vmem:[%s6444_s0 + $0x60] sm:$0xff]  ;;  %s3865_s16 = sshll.u32 %s4844_s28, 10 }
  0x17   : > { %399 = vperm.xlu1 %4712, %v4874_v0   ;;  %389 = vperm.xlu0 %4711, %v4879_v1   ;;  %281 = vst [vmem:[#allocation3 + $0x8] sm:$0xff] %v4779_v3  ;;  %282 = vst [vmem:[#allocation3 + $0x50] sm:$0xff] %v4779_v3  ;;  %v4903_v6 = vld [vmem:[%s6444_s0 + $0x68] sm:$0xff]  ;;  %p274_p10 = scmp.lt.s32.totalorder %s3656_s21, 15  ;;  %v4915_v8 = vld [vmem:[%s6444_s0 + $0x78] sm:$0xff]  ;;  %s4780_s23 = smov [#allocation5]  }
  0x18   : > { %283 = vst [vmem:[#allocation3 + $0x58] sm:$0xff] %v4779_v3  ;;  %285 = vst.msk [vmem:[#allocation2] sm:$0xff] %vm284_vm0, %v4779_v3  ;;  %v4920_v9 = vld [vmem:[%s6444_s0 + $0x70] sm:$0xff]  ;;  %v4927_v10 = vld [vmem:[%s6444_s0 + $0x8] sm:$0xff]  ;;  %s4718_s8 = sshll.u32 %s4780_s23, 4  ;;  %s4719_s8 = int_to_ptr.vmem [resolvable:$false] %s4718_s8 }
  0x19   : > { %287 = vst.msk [vmem:[#allocation2 + $0x50] sm:$0xff] %vm284_vm0, %v4779_v3  ;;  %288 = vst.msk [vmem:[#allocation2 + $0x58] sm:$0xff] %vm284_vm0, %v4779_v3  ;;  %s6519_s21 = smov (!%p274_p10, %s3656_s21), 15  ;;  %v4932_v11 = vld [vmem:[%s6444_s0] sm:$0xff]  ;;  %v4944_v12 = vld [vmem:[%s6444_s0 + $0x18] sm:$0xff]  ;;  %s4720_s9 = scalar_lea.vmem %s4719_s8, 2048 }
  0x1a   : > { %s3657_s20 = sshll.u32 %s6519_s21, 3  ;;  %v4949_v13 = vld [vmem:[%s6444_s0 + $0x10] sm:$0xff]  ;;  %v4954_v14 = vld [vmem:[%s6444_s0 + $0x28] sm:$0xff]  ;;  %v4959_v15 = vld [vmem:[%s6444_s0 + $0x20] sm:$0xff] }
  0x1b   : > { %404 = vperm.xlu1 %4712, %v4890_v4   ;;  %394 = vperm.xlu0 %4711, %v4895_v5   ;;  %s4939_s29 = scalar_lea.vmem %s6445_s1, %s3657_s20  ;;  %v3666_v17 = vld [vmem:[%s6446_s2 + $0x8] sm:$0xff]  ;;  %v4981_v20 = vld [vmem:[%s6446_s2] sm:$0xff]  ;;  %v5010_v25 = vld [vmem:[%s6444_s0 + $0x38] sm:$0xff]  ;;  %s6395_s20 = scalar_lea.hbm %s6451_s7, %s3865_s16 }
  0x1c   : > { %v4962_v16 = vld [vmem:[%s4939_s29 + $0x8] sm:$0xff]  ;;  %v4972_v18 = vld [vmem:[%s4939_s29 + $0x10] sm:$0xff]  ;;  %v289_v19 = vld [vmem:[%s4939_s29] sm:$0xff]  ;;  %4204 = vmatprep.subr.mxu0 %v3666_v17 }
  0x1d   : > { %298 = vst.msk [vmem:[#allocation2 + $0x18] sm:$0xff] %vm284_vm0, %v4962_v16  ;;  %299 = vst.msk [vmem:[#allocation2 + $0x20] sm:$0xff] %vm284_vm0, %v4972_v18  ;;  %v4984_v21 = vld [vmem:[%s4939_s29 + $0x20] sm:$0xff]  ;;  %v4987_v22 = vld [vmem:[%s4939_s29 + $0x18] sm:$0xff]  ;;  %4332 = vmatprep.mubr.msk.f32.mxu1 %vm284_vm0, %v289_v19  ;;  %4205 = vmatpush3.msra.mxu0 %v3666_v17 }
  0x1e   : > { %297 = vst.msk [vmem:[#allocation2 + $0x10] sm:$0xff] %vm284_vm0, %v289_v19  ;;  %301 = vst.msk [vmem:[#allocation2 + $0x30] sm:$0xff] %vm284_vm0, %v4984_v21  ;;  %v4995_v23 = vld [vmem:[%s4939_s29 + $0x30] sm:$0xff]  ;;  %v4998_v24 = vld [vmem:[%s4939_s29 + $0x28] sm:$0xff]  ;;  %4218 = vmatprep.subr.mxu0 %v4981_v20 }
  0x1f   : > { %414 = vperm.xlu1 %4712, %v4903_v6   ;;  %409 = vperm.xlu0 %4711, %v4908_v7   ;;  %300 = vst.msk [vmem:[#allocation2 + $0x28] sm:$0xff] %vm284_vm0, %v4987_v22  ;;  %303 = vst.msk [vmem:[#allocation2 + $0x40] sm:$0xff] %vm284_vm0, %v4995_v23  ;;  %v5015_v26 = vld [vmem:[%s6444_s0 + $0x30] sm:$0xff]  ;;  %v5022_v27 = vld [vmem:[%s6444_s0 + $0x88] sm:$0xff] }
  0x20   : > { %302 = vst.msk [vmem:[#allocation2 + $0x38] sm:$0xff] %vm284_vm0, %v4998_v24  ;;  %v5027_v28 = vld [vmem:[%s6444_s0 + $0x80] sm:$0xff]  ;;  %v5034_v29 = vld [vmem:[%s6444_s0 + $0x98] sm:$0xff]  ;;  %v5039_v30 = vld [vmem:[%s6444_s0 + $0x90] sm:$0xff] }
  0x21   : > { %v5042_v31 = vld [vmem:[%s4939_s29 + $0x38] sm:$0xff]  ;;  %v5051_v32 = vld [vmem:[%s6444_s0 + $0xa8] sm:$0xff]  ;;  %v5056_v33 = vld [vmem:[%s6444_s0 + $0xa0] sm:$0xff]  ;;  %s270_s29 = sand.u32 1, %s4768_s25  }
  0x22   : > { %304 = vst.msk [vmem:[#allocation2 + $0x48] sm:$0xff] %vm284_vm0, %v5042_v31  ;;  %v5063_v34 = vld [vmem:[%s6444_s0 + $0xb8] sm:$0xff]  ;;  %v5068_v35 = vld [vmem:[%s6444_s0 + $0xb0] sm:$0xff]  ;;  %v5075_v36 = vld [vmem:[%s6444_s0 + $0xc8] sm:$0xff]  ;;  %s3655_s13 = sshll.u32 %s270_s29, 6  ;;  %s6403_s28 = scalar_lea.sflag [#allocation6], %s270_s29 }
  0x23   : > { %424 = vperm.xlu1 %4712, %v4915_v8   ;;  %419 = vperm.xlu0 %4711, %v4920_v9   ;;  %v5080_v37 = vld [vmem:[%s6444_s0 + $0xc0] sm:$0xff]  ;;  %v5087_v38 = vld [vmem:[%s6444_s0 + $0xd8] sm:$0xff]  ;;  %v5092_v39 = vld [vmem:[%s6444_s0 + $0xd0] sm:$0xff]  ;;  %s6379_s15 = scalar_lea.vmem [#allocation5], %s3655_s13 }
  0x24   : > { %v5099_v40 = vld [vmem:[%s6444_s0 + $0xe8] sm:$0xff]  ;;  %v5104_v41 = vld [vmem:[%s6444_s0 + $0xe0] sm:$0xff]  ;;  %v5111_v42 = vld [vmem:[%s6444_s0 + $0xf8] sm:$0xff]  ;;  %s3589_s17 = sshll.u32 %s6379_s15, 4  ;;  %s6397_s17 = int_to_ptr.vmem [resolvable:$true] %s3589_s17 }
  0x25   : > { %v5116_v43 = vld [vmem:[%s6444_s0 + $0xf0] sm:$0xff]  ;;  %v5123_v44 = vld [vmem:[%s6444_s0 + $0x148] sm:$0xff]  ;;  %v5128_v45 = vld [vmem:[%s6444_s0 + $0x140] sm:$0xff]  ;;  %s4714_s22 = scalar_lea.vmem %s6397_s17, 1024  ;;  %p4721_p0 = scmp.lt.s32.totalorder %s6397_s17, %s4719_s8 }
  0x26   : > { %v5135_v46 = vld [vmem:[%s6444_s0 + $0x158] sm:$0xff]  ;;  %v5140_v47 = vld [vmem:[%s6444_s0 + $0x150] sm:$0xff]  ;;  %v5147_v48 = vld [vmem:[%s6444_s0 + $0x168] sm:$0xff]  ;;  %p4715_p11 = scmp.ne.s32.totalorder %s6397_s17, %s4714_s22  ;;  %p4722_p1 = scmp.lt.s32.totalorder %s4720_s9, %s4714_s22 }
  0x27   : > { %328 = vperm.xlu1 %4712, %v4927_v10   ;;  %323 = vperm.xlu0 %4711, %v4932_v11   ;;  %v5152_v49 = vld [vmem:[%s6444_s0 + $0x160] sm:$0xff]  ;;  %v5159_v50 = vld [vmem:[%s6444_s0 + $0x178] sm:$0xff]  ;;  %v5164_v51 = vld [vmem:[%s6444_s0 + $0x170] sm:$0xff] }
  0x28   : > { %v5171_v52 = vld [vmem:[%s6444_s0 + $0x188] sm:$0xff]  ;;  %v5176_v53 = vld [vmem:[%s6444_s0 + $0x180] sm:$0xff]  ;;  %v5183_v54 = vld [vmem:[%s6444_s0 + $0x198] sm:$0xff]  ;;  %p4716_p12 = pnand %p4715_p11, %p4861_p5  ;;  %p4723_p2 = por %p4722_p1, %p4721_p0 }
  0x29   : > { %v5188_v55 = vld [vmem:[%s6444_s0 + $0x190] sm:$0xff]  ;;  %v5195_v56 = vld [vmem:[%s6444_s0 + $0x1a8] sm:$0xff]  ;;  %v5200_v57 = vld [vmem:[%s6444_s0 + $0x1a0] sm:$0xff] }
  0x2a   : > { %6472 = vst [vmem:[#allocation8_spill] sm:$0xff] %v5195_v56  ;;  %6473 = vst [vmem:[#allocation9_spill] sm:$0xff] %v5200_v57  ;;  %v5207_v58 = vld [vmem:[%s6444_s0 + $0x1b8] sm:$0xff]  ;;  %v5212_v59 = vld [vmem:[%s6444_s0 + $0x1b0] sm:$0xff]  ;;  %p4717_p13 = pneg %p4716_p12 }
  0x2b   : > { %338 = vperm.xlu1 %4712, %v4944_v12   ;;  %333 = vperm.xlu0 %4711, %v4949_v13   ;;  %6474 = vst [vmem:[#allocation10_spill] sm:$0xff] %v5207_v58  ;;  %6475 = vst [vmem:[#allocation11_spill] sm:$0xff] %v5212_v59  ;;  %v5219_v60 = vld [vmem:[%s6444_s0 + $0x1c8] sm:$0xff]  ;;  %v5224_v61 = vld [vmem:[%s6444_s0 + $0x1c0] sm:$0xff] }
  0x2c   : > { %v5229_v62 = vld [vmem:[%s6444_s0 + $0x1d8] sm:$0xff]  ;;  %v2897_v63 = vld [vmem:[%s6449_s5] sm:$0xff]  ;;  %v2770_v3 = vld [vmem:[%s6448_s4 + $0x88] sm:$0xff]  ;;  %p4724_p3 = pnand %p4723_p2, %p4717_p13 }
  0x2d   : > { %v2769_v2 = vld [vmem:[%s6448_s4 + $0x80] sm:$0xff]  ;;  %v5245_v17 = vld [vmem:[%s6444_s0 + $0x1d0] sm:$0xff]  ;;  %4330 = vmatprep.subr.mxu1 %v2897_v63 }
  0x2e   : > { %v4388_v19 = vpack.c.bf16 %v2770_v3, %v2769_v2  ;;  %4331 = vmatpush3.msra.mxu1 %v2897_v63  ;;  %v5260_v2 = vld [vmem:[%s6444_s0 + $0x1e8] sm:$0xff]  ;;  %v2771_v3 = vld [vmem:[%s6448_s4 + $0x90] sm:$0xff] }
  0x2f   : > { %348 = vperm.xlu1 %4712, %v4954_v14   ;;  %343 = vperm.xlu0 %4711, %v4959_v15   ;;  %v2755_v63 = vld [vmem:[%s6448_s4 + $0x10] sm:$0xff] }
  0x30   : > { %4389 = vmatprep.subr.bf16.mxu1 %v4388_v19  ;;  %4333 = vmatmul.mubr.msk.f32.vlgmr.msra.gmra.mrb[0].mxu1 %vm284_vm0, %v4962_v16  ;;  %v5271_v16 = vld [vmem:[%s6444_s0 + $0x1e0] sm:$0xff]  ;;  %v2756_v19 = vld [vmem:[%s6448_s4 + $0x18] sm:$0xff] }
  0x31   : > { %4335 = vmatprep.mubr.msk.f32.mxu1 %vm284_vm0, %v4972_v18  ;;  %v2774_v18 = vld [vmem:[%s6448_s4 + $0xa8] sm:$0xff] }
  0x33   : > { %358 = vperm.xlu1 %4712, %v5010_v25   ;;  %353 = vperm.xlu0 %4711, %v5015_v26  }
  0x34   : > { %4336 = vmatmul.mubr.msk.f32.gmra.mrb[2].mxu1 %vm284_vm0, %v4987_v22  ;;  %v5299_v22 = vld [vmem:[%s6444_s0 + $0x1f0] sm:$0xff] }
  0x35   : > { %6477 = vst [vmem:[#allocation13_spill] sm:$0xff] %v5299_v22  ;;  %4338 = vmatprep.mubr.msk.f32.mxu1 %vm284_vm0, %v4984_v21  ;;  %v2776_v21 = vld [vmem:[%s6448_s4 + $0xb8] sm:$0xff] }
  0x37   : > { %719 = vperm.xlu1 %4712, %v5022_v27   ;;  %714 = vperm.xlu0 %4711, %v5027_v28  }
  0x38   : > { %4339 = vmatmul.mubr.msk.f32.gmra.mrb[4].mxu1 %vm284_vm0, %v4998_v24  ;;  %v5327_v24 = vld [vmem:[%s6444_s0 + $0x200] sm:$0xff] }
  0x39   : > { %6479 = vst [vmem:[#allocation15_spill] sm:$0xff] %v5327_v24  ;;  %4341 = vmatprep.mubr.msk.f32.mxu1 %vm284_vm0, %v4995_v23  ;;  %v2778_v23 = vld [vmem:[%s6448_s4 + $0xc8] sm:$0xff] }
  0x3b   : > { %729 = vperm.xlu1 %4712, %v5034_v29   ;;  %724 = vperm.xlu0 %4711, %v5039_v30  }
  0x3c   : > { %4342 = vmatmul.mubr.msk.f32.gmra.mrb[6].mxu1 %vm284_vm0, %v5042_v31  ;;  %v5353_v31 = vld [vmem:[%s6444_s0 + $0x210] sm:$0xff] }
  0x3d   : > { %6480 = vst [vmem:[#allocation16_spill] sm:$0xff] %v5353_v31 }
  0x3f   : > { %739 = vperm.xlu1 %4712, %v5051_v32   ;;  %734 = vperm.xlu0 %4711, %v5056_v33  }
  0x43   : > { %749 = vperm.xlu1 %4712, %v5063_v34   ;;  %744 = vperm.xlu0 %4711, %v5068_v35  }
  0x47   : > { %923 = vperm.xlu1 %4712, %v5075_v36   ;;  %918 = vperm.xlu0 %4711, %v5080_v37  }
  0x4b   : > { %933 = vperm.xlu1 %4712, %v5087_v38   ;;  %928 = vperm.xlu0 %4711, %v5092_v39  }
  0x4f   : > { %943 = vperm.xlu1 %4712, %v5099_v40   ;;  %938 = vperm.xlu0 %4711, %v5104_v41  }
  0x53   : > { %953 = vperm.xlu1 %4712, %v5111_v42   ;;  %948 = vperm.xlu0 %4711, %v5116_v43  }
  0x57   : > { %1274 = vperm.xlu1 %4712, %v5123_v44   ;;  %1269 = vperm.xlu0 %4711, %v5128_v45  }
  0x5b   : > { %1284 = vperm.xlu1 %4712, %v5135_v46   ;;  %1279 = vperm.xlu0 %4711, %v5140_v47  }
  0x5f   : > { %1294 = vperm.xlu1 %4712, %v5147_v48   ;;  %1289 = vperm.xlu0 %4711, %v5152_v49  }
  0x63   : > { %1304 = vperm.xlu1 %4712, %v5159_v50   ;;  %1299 = vperm.xlu0 %4711, %v5164_v51  }
  0x67   : > { %1478 = vperm.xlu1 %4712, %v5171_v52   ;;  %1473 = vperm.xlu0 %4711, %v5176_v53  }
  0x6b   : > { %1488 = vperm.xlu1 %4712, %v5183_v54   ;;  %1483 = vperm.xlu0 %4711, %v5188_v55  }
  0x6f   : > { %1498 = vperm.xlu1 %4712, %v5195_v56   ;;  %1493 = vperm.xlu0 %4711, %v5200_v57   ;;  %v4394_v57 = vpack.c.bf16 %v2756_v19, %v2755_v63  ;;  %v2758_v63 = vld [vmem:[%s6448_s4 + $0x28] sm:$0xff] }
  0x73   : > { %1508 = vperm.xlu1 %4712, %v5207_v58   ;;  %1503 = vperm.xlu0 %4711, %v5212_v59   ;;  %v2753_v58 = vld [vmem:[%s6448_s4] sm:$0xff]  ;;  %v2754_v59 = vld [vmem:[%s6448_s4 + $0x8] sm:$0xff] }
  0x74   : > { %v4390_v56 = vpack.c.bf16 %v2754_v59, %v2753_v58  ;;  %v2772_v58 = vld [vmem:[%s6448_s4 + $0x98] sm:$0xff] }
  0x75   : > { %v4392_v59 = vpack.c.bf16 %v2772_v58, %v2771_v3  ;;  %v2773_v3 = vld [vmem:[%s6448_s4 + $0xa0] sm:$0xff] }
  0x76   : > { %4391 = vmatpush3.bf16.msra.mxu1 %v4390_v56  ;;  %v5288_v56 = vld [vmem:[%s6444_s0 + $0x1f8] sm:$0xff]  ;;  %v4396_v58 = vpack.c.bf16 %v2774_v18, %v2773_v3  ;;  %v2775_v3 = vld [vmem:[%s6448_s4 + $0xb0] sm:$0xff] }
  0x77   : > { %1682 = vperm.xlu1 %4712, %v5219_v60   ;;  %1677 = vperm.xlu0 %4711, %v5224_v61   ;;  %6476 = vst [vmem:[#allocation12_spill] sm:$0xff] %v5288_v56  ;;  %v4400_v18 = vpack.c.bf16 %v2776_v21, %v2775_v3  ;;  %v2777_v3 = vld [vmem:[%s6448_s4 + $0xc0] sm:$0xff] }
  0x78   : > { %4393 = vmatprep.subr.bf16.mxu1 %v4392_v59  ;;  %v2757_v59 = vld [vmem:[%s6448_s4 + $0x20] sm:$0xff]  ;;  %v4404_v21 = vpack.c.bf16 %v2778_v23, %v2777_v3  ;;  %v2780_v3 = vld [vmem:[%s6448_s4 + $0xd8] sm:$0xff] }
  0x79   : > { %v4398_v19 = vpack.c.bf16 %v2758_v63, %v2757_v59  ;;  %v2760_v59 = vld [vmem:[%s6448_s4 + $0x38] sm:$0xff]  ;;  %v5376_v23 = vld [vmem:[%s6444_s0 + $0x220] sm:$0xff] }
  0x7a   : > { %4395 = vmatpush3.bf16.msra.mxu1 %v4394_v57  ;;  %v5316_v57 = vld [vmem:[%s6444_s0 + $0x208] sm:$0xff]  ;;  %6482 = vst [vmem:[#allocation18_spill] sm:$0xff] %v5376_v23 }
  0x7b   : > { %1692 = vperm.xlu1 %4712, %v5229_v62   ;;  %1687 = vperm.xlu0 %4711, %v5245_v17   ;;  %6478 = vst [vmem:[#allocation14_spill] sm:$0xff] %v5316_v57 }
  0x7c   : > { %4397 = vmatprep.subr.bf16.mxu1 %v4396_v58  ;;  %v2759_v58 = vld [vmem:[%s6448_s4 + $0x30] sm:$0xff] }
  0x7d   : > { %v4402_v63 = vpack.c.bf16 %v2760_v59, %v2759_v58  ;;  %v2762_v58 = vld [vmem:[%s6448_s4 + $0x48] sm:$0xff] }
  0x7e   : > { %4399 = vmatpush3.bf16.msra.mxu1 %v4398_v19  ;;  %v3780_v19 = vld [vmem:[%s6444_s0 + $0x218] sm:$0xff] }
  0x7f   : > { %1702 = vperm.xlu1 %4712, %v5260_v2   ;;  %1697 = vperm.xlu0 %4711, %v5271_v16  }
  0x80   : > { %4401 = vmatprep.subr.bf16.mxu1 %v4400_v18  ;;  %v2761_v18 = vld [vmem:[%s6448_s4 + $0x40] sm:$0xff] }
  0x81   : > { %v4406_v59 = vpack.c.bf16 %v2762_v58, %v2761_v18  ;;  %v2764_v18 = vld [vmem:[%s6448_s4 + $0x58] sm:$0xff] }
  0x82   : > { %4403 = vmatpush3.bf16.msra.mxu1 %v4402_v63  ;;  %v2779_v63 = vld [vmem:[%s6448_s4 + $0xd0] sm:$0xff] }
  0x83   : > { %1712 = vperm.xlu1 %4712, %v5288_v56   ;;  %1707 = vperm.xlu0 %4711, %v5299_v22  }
  0x84   : > { %4405 = vmatprep.subr.bf16.mxu1 %v4404_v21  ;;  %v2763_v21 = vld [vmem:[%s6448_s4 + $0x50] sm:$0xff] }
  0x85   : > { %v4410_v58 = vpack.c.bf16 %v2764_v18, %v2763_v21  ;;  %v2765_v21 = vld [vmem:[%s6448_s4 + $0x60] sm:$0xff]  ;;  %v2766_v18 = vld [vmem:[%s6448_s4 + $0x68] sm:$0xff] }
  0x86   : > { %4407 = vmatpush3.bf16.msra.mxu1 %v4406_v59  ;;  %v2781_v59 = vld [vmem:[%s6448_s4 + $0xe0] sm:$0xff] }
  0x87   : > { %1886 = vperm.xlu1 %4712, %v5316_v57   ;;  %1881 = vperm.xlu0 %4711, %v5327_v24   ;;  %v5365_v57 = vld [vmem:[%s6444_s0 + $0x228] sm:$0xff]  ;;  %v2783_v24 = vld [vmem:[%s6448_s4 + $0xf0] sm:$0xff] }
  0x88   : > { %6481 = vst [vmem:[#allocation17_spill] sm:$0xff] %v5365_v57 }
  0x8b   : > { %1896 = vperm.xlu1 %4712, %v3780_v19   ;;  %1891 = vperm.xlu0 %4711, %v5353_v31   ;;  %v4408_v19 = vpack.c.bf16 %v2780_v3, %v2779_v63  ;;  %v5389_v31 = vld [vmem:[%s6444_s0 + $0x238] sm:$0xff]  ;;  %v2782_v63 = vld [vmem:[%s6448_s4 + $0xe8] sm:$0xff]  ;;  %v5400_v3 = vld [vmem:[%s6444_s0 + $0x230] sm:$0xff] }
  0x8c   : > { %6483 = vst [vmem:[#allocation19_spill] sm:$0xff] %v5389_v31  ;;  %6484 = vst [vmem:[#allocation20_spill] sm:$0xff] %v5400_v3 }
  0x8d   : > { %4409 = vmatprep.subr.bf16.mxu1 %v4408_v19  ;;  %v4412_v19 = vpack.c.bf16 %v2782_v63, %v2781_v59  ;;  %v370_v59 = vld [vmem:[#allocation2 + $0x8] sm:$0xff] }
  0x8e   : > { %4411 = vmatpush3.bf16.msra.mxu1 %v4410_v58  ;;  %v2784_v58 = vld [vmem:[%s6448_s4 + $0xf8] sm:$0xff] }
  0x8f   : > { %1906 = vperm.xlu1 %4712, %v5365_v57   ;;  %1901 = vperm.xlu0 %4711, %v5376_v23   ;;  %v4414_v57 = vpack.c.bf16 %v2766_v18, %v2765_v21  ;;  %v4416_v63 = vpack.c.bf16 %v2784_v58, %v2783_v24  ;;  %v2767_v21 = vld [vmem:[%s6448_s4 + $0x70] sm:$0xff]  ;;  %v5422_v23 = vld [vmem:[#allocation2 + $0x18] sm:$0xff] }
  0x90   : > { %4413 = vmatprep.subr.bf16.mxu1 %v4412_v19  ;;  %v2768_v19 = vld [vmem:[%s6448_s4 + $0x78] sm:$0xff]  ;;  %v5426_v24 = vld [vmem:[#allocation2 + $0x10] sm:$0xff] }
  0x91   : > { %v4418_v18 = vpack.c.bf16 %v2768_v19, %v2767_v21 }
  0x92   : > { %4415 = vmatpush3.bf16.msra.mxu1 %v4414_v57 }
  0x93   : > { %1916 = vperm.xlu1 %4712, %v5389_v31   ;;  %1911 = vperm.xlu0 %4711, %v5400_v3  }
  0x94   : > { %4417 = vmatprep.subr.bf16.mxu1 %v4416_v63  ;;  %v5433_v63 = vld [vmem:[#allocation2 + $0x20] sm:$0xff] }
  0x96   : > { %v400_v31 = vpop.permute.xlu1 %399  ;;  %v390_v3 = vpop.permute.xlu0 %389  ;;  %4419 = vmatpush3.bf16.msra.mxu1 %v4418_v18 }
  0x97   : > { %2115 = vperm.xlu1 %4712, %v4932_v11   ;;  %2187 = vperm.xlu0 %4711, %v4879_v1   ;;  %v427_v57 = vmul.f32 %v390_v3, %v370_v59  ;;  %v429_v58 = vmul.f32 %v400_v31, %v5422_v23  ;;  %v5435_v11 = vld [vmem:[#allocation2 + $0x28] sm:$0xff]  ;;  %v3691_v1 = vld [vmem:[%s6446_s2 + $0x10] sm:$0xff]  ;;  %v5449_v59 = vld [vmem:[#allocation2 + $0x38] sm:$0xff] }
  0x99   : > { %4206 = vmatprep.mubr.msk.f32.mxu0 %vm284_vm0, %v427_v57 }
  0x9a   : > { %v405_v56 = vpop.permute.xlu1 %404  ;;  %v395_v22 = vpop.permute.xlu0 %394 }
  0x9b   : > { %v428_v21 = vmul.f32 %v395_v22, %v5426_v24  ;;  %2120 = vperm.xlu1 %4712, %v4927_v10   ;;  %2192 = vperm.xlu0 %4711, %v4895_v5   ;;  %v430_v10 = vmul.f32 %v405_v56, %v5433_v63  ;;  %v5447_v22 = vld [vmem:[#allocation2 + $0x30] sm:$0xff] }
  0x9d   : > { %4207 = vmatmul.mubr.msk.f32.vlgmr.msra.gmra.mrb[0].mxu0 %vm284_vm0, %v428_v21 }
  0x9e   : > { %4219 = vmatpush3.msra.mxu0 %v4981_v20  ;;  %v415_v31 = vpop.permute.xlu1 %414  ;;  %v410_v3 = vpop.permute.xlu0 %409  ;;  %4209 = vmatprep.mubr.msk.f32.mxu0 %vm284_vm0, %v429_v58 }
  0x9f   : > { %v431_v5 = vmul.f32 %v410_v3, %v5435_v11  ;;  %2125 = vperm.xlu1 %4712, %v4949_v13   ;;  %2197 = vperm.xlu0 %4711, %v4874_v0   ;;  %v432_v18 = vmul.f32 %v415_v31, %v5447_v22  ;;  %v5457_v0 = vld [vmem:[#allocation2 + $0x40] sm:$0xff]  ;;  %v5464_v31 = vld [vmem:[#allocation2 + $0xf] sm:$0xff] }
  0xa0   : > { %4232 = vmatprep.subr.mxu0 %v3691_v1  ;;  %v305_v13 = vld [vmem:[#allocation2 + $0x7] sm:$0xff] }
  0xa1   : > { %4210 = vmatmul.mubr.msk.f32.gmra.mrb[2].mxu0 %vm284_vm0, %v430_v10 }
  0xa2   : > { %v425_v20 = vpop.permute.xlu1 %424  ;;  %v420_v19 = vpop.permute.xlu0 %419  ;;  %4212 = vmatprep.mubr.msk.f32.mxu0 %vm284_vm0, %v431_v5 }
  0xa3   : > { %v433_v56 = vmul.f32 %v420_v19, %v5449_v59  ;;  %2130 = vperm.xlu1 %4712, %v4944_v12   ;;  %2202 = vperm.xlu0 %4711, %v4890_v4   ;;  %v434_v21 = vmul.f32 %v425_v20, %v5457_v0  ;;  %v5466_v12 = vld [vmem:[#allocation2 + $0x17] sm:$0xff] }
  0xa4   : > { %v3708_v20 = vld [vmem:[%s6446_s2 + $0x18] sm:$0xff] }
  0xa5   : > { %4213 = vmatmul.mubr.msk.f32.gmra.mrb[4].mxu0 %vm284_vm0, %v432_v18 }
  0xa6   : > { %v329_v57 = vpop.permute.xlu1 %328  ;;  %v324_v58 = vpop.permute.xlu0 %323  ;;  %4215 = vmatprep.mubr.msk.f32.mxu0 %vm284_vm0, %v433_v56 }
  0xa7   : > { %v361_v3 = vmul.f32 %v324_v58, %v305_v13  ;;  %2135 = vperm.xlu1 %4712, %v4959_v15   ;;  %2207 = vperm.xlu0 %4711, %v4908_v7   ;;  %v362_v5 = vmul.f32 %v329_v57, %v5464_v31  ;;  %v5474_v15 = vld [vmem:[#allocation2 + $0x1f] sm:$0xff]  ;;  %v5476_v7 = vld [vmem:[#allocation2 + $0x27] sm:$0xff]  ;;  %v5489_v57 = vld [vmem:[#allocation2 + $0x37] sm:$0xff] }
  0xa9   : > { %4216 = vmatmul.mubr.msk.f32.gmra.mrb[6].mxu0 %vm284_vm0, %v434_v21 }
  0xaa   : > { %v339_v4 = vpop.permute.xlu1 %338  ;;  %v334_v10 = vpop.permute.xlu0 %333  ;;  %4220 = vmatprep.mubr.msk.f32.mxu0 %vm284_vm0, %v361_v3 }
  0xab   : > { %v363_v19 = vmul.f32 %v334_v10, %v5466_v12  ;;  %2140 = vperm.xlu1 %4712, %v4954_v14   ;;  %2212 = vperm.xlu0 %4711, %v4903_v6   ;;  %v364_v13 = vmul.f32 %v339_v4, %v5474_v15  ;;  %v5487_v6 = vld [vmem:[#allocation2 + $0x2f] sm:$0xff] }
  0xad   : > { %4221 = vmatmul.mubr.msk.f32.vlgmr.msra.gmra.mrb[0].mxu0 %vm284_vm0, %v362_v5 }
  0xae   : > { %4233 = vmatpush3.msra.mxu0 %v3691_v1  ;;  %v349_v18 = vpop.permute.xlu1 %348  ;;  %v344_v56 = vpop.permute.xlu0 %343  ;;  %4223 = vmatprep.mubr.msk.f32.mxu0 %vm284_vm0, %v363_v19 }
  0xaf   : > { %v365_v14 = vmul.f32 %v344_v56, %v5476_v7  ;;  %2145 = vperm.xlu1 %4712, %v5015_v26   ;;  %2217 = vperm.xlu0 %4711, %v4920_v9   ;;  %v366_v21 = vmul.f32 %v349_v18, %v5487_v6  ;;  %v5497_v9 = vld [vmem:[#allocation2 + $0x3f] sm:$0xff]  ;;  %v695_v26 = vld [vmem:[#allocation2 + $0x9] sm:$0xff]  ;;  %v5504_v18 = vld [vmem:[#allocation2 + $0x11] sm:$0xff] }
  0xb0   : > { %4246 = vmatprep.subr.mxu0 %v3708_v20 }
  0xb1   : > { %4224 = vmatmul.mubr.msk.f32.gmra.mrb[2].mxu0 %vm284_vm0, %v364_v13 }
  0xb2   : > { %v359_v1 = vpop.permute.xlu1 %358  ;;  %v354_v58 = vpop.permute.xlu0 %353  ;;  %4226 = vmatprep.mubr.msk.f32.mxu0 %vm284_vm0, %v365_v14 }
  0xb3   : > { %v367_v3 = vmul.f32 %v354_v58, %v5489_v57  ;;  %2150 = vperm.xlu1 %4712, %v5010_v25   ;;  %2222 = vperm.xlu0 %4711, %v4915_v8   ;;  %v368_v5 = vmul.f32 %v359_v1, %v5497_v9  ;;  %v5506_v25 = vld [vmem:[#allocation2 + $0x19] sm:$0xff] }
  0xb4   : > { %v3717_v1 = vld [vmem:[%s6446_s2 + $0x20] sm:$0xff] }
  0xb5   : > { %4227 = vmatmul.mubr.msk.f32.gmra.mrb[4].mxu0 %vm284_vm0, %v366_v21 }
  0xb6   : > { %v720_v4 = vpop.permute.xlu1 %719  ;;  %v715_v10 = vpop.permute.xlu0 %714  ;;  %4229 = vmatprep.mubr.msk.f32.mxu0 %vm284_vm0, %v367_v3 }
  0xb7   : > { %v752_v19 = vmul.f32 %v715_v10, %v695_v26  ;;  %2259 = vperm.xlu1 %4712, %v5027_v28   ;;  %2331 = vperm.xlu0 %4711, %v5080_v37   ;;  %v753_v13 = vmul.f32 %v720_v4, %v5504_v18  ;;  %v5514_v28 = vld [vmem:[#allocation2 + $0x21] sm:$0xff]  ;;  %v5516_v37 = vld [vmem:[#allocation2 + $0x29] sm:$0xff]  ;;  %v5529_v26 = vld [vmem:[#allocation2 + $0x39] sm:$0xff] }
  0xb9   : > { %4230 = vmatmul.mubr.msk.f32.gmra.mrb[6].mxu0 %vm284_vm0, %v368_v5 }
  0xba   : > { %v730_v8 = vpop.permute.xlu1 %729  ;;  %v725_v56 = vpop.permute.xlu0 %724  ;;  %4234 = vmatprep.mubr.msk.f32.mxu0 %vm284_vm0, %v752_v19 }
  0xbb   : > { %v754_v14 = vmul.f32 %v725_v56, %v5506_v25  ;;  %2264 = vperm.xlu1 %4712, %v5022_v27   ;;  %2336 = vperm.xlu0 %4711, %v5075_v36   ;;  %v755_v3 = vmul.f32 %v730_v8, %v5514_v28  ;;  %v5527_v36 = vld [vmem:[#allocation2 + $0x31] sm:$0xff] }
  0xbd   : > { %4235 = vmatmul.mubr.msk.f32.vlgmr.msra.gmra.mrb[0].mxu0 %vm284_vm0, %v753_v13 }
  0xbe   : > { %4247 = vmatpush3.msra.mxu0 %v3708_v20  ;;  %v740_v58 = vpop.permute.xlu1 %739  ;;  %v735_v21 = vpop.permute.xlu0 %734  ;;  %4237 = vmatprep.mubr.msk.f32.mxu0 %vm284_vm0, %v754_v14 }
  0xbf   : > { %v756_v27 = vmul.f32 %v735_v21, %v5516_v37  ;;  %2269 = vperm.xlu1 %4712, %v5039_v30   ;;  %2341 = vperm.xlu0 %4711, %v5092_v39   ;;  %v757_v10 = vmul.f32 %v740_v58, %v5527_v36  ;;  %v5537_v30 = vld [vmem:[#allocation2 + $0x41] sm:$0xff] }
  0xc0   : > { %4260 = vmatprep.subr.mxu0 %v3717_v1 }
  0xc1   : > { %4238 = vmatmul.mubr.msk.f32.gmra.mrb[2].mxu0 %vm284_vm0, %v755_v3 }
  0xc2   : > { %v750_v20 = vpop.permute.xlu1 %749  ;;  %v745_v4 = vpop.permute.xlu0 %744  ;;  %4240 = vmatprep.mubr.msk.f32.mxu0 %vm284_vm0, %v756_v27  ;;  %v5566_v27 = vld [vmem:[#allocation2 + $0x47] sm:$0xff] }
  0xc3   : > { %v758_v5 = vmul.f32 %v745_v4, %v5529_v26  ;;  %2274 = vperm.xlu1 %4712, %v5034_v29   ;;  %2346 = vperm.xlu0 %4711, %v5087_v38   ;;  %v759_v8 = vmul.f32 %v750_v20, %v5537_v30 }
  0xc5   : > { %4241 = vmatmul.mubr.msk.f32.gmra.mrb[4].mxu0 %vm284_vm0, %v757_v10 }
  0xc6   : > { %v924_v39 = vpop.permute.xlu1 %923  ;;  %v919_v19 = vpop.permute.xlu0 %918  ;;  %4243 = vmatprep.mubr.msk.f32.mxu0 %vm284_vm0, %v758_v5 }
  0xc7   : > { %v956_v56 = vmul.f32 %v919_v19, %v5464_v31  ;;  %2279 = vperm.xlu1 %4712, %v5056_v33   ;;  %2351 = vperm.xlu0 %4711, %v5104_v41   ;;  %v957_v13 = vmul.f32 %v924_v39, %v5466_v12  ;;  %v3734_v33 = vld [vmem:[%s6446_s2 + $0x28] sm:$0xff] }
  0xc9   : > { %4244 = vmatmul.mubr.msk.f32.gmra.mrb[6].mxu0 %vm284_vm0, %v759_v8 }
  0xca   : > { %v934_v29 = vpop.permute.xlu1 %933  ;;  %v929_v38 = vpop.permute.xlu0 %928  ;;  %4248 = vmatprep.mubr.msk.f32.mxu0 %vm284_vm0, %v956_v56 }
  0xcb   : > { %v958_v14 = vmul.f32 %v929_v38, %v5474_v15  ;;  %2284 = vperm.xlu1 %4712, %v5051_v32   ;;  %2356 = vperm.xlu0 %4711, %v5099_v40   ;;  %v959_v58 = vmul.f32 %v934_v29, %v5476_v7  ;;  %v5623_v29 = vld [vmem:[#allocation2 + $0x49] sm:$0xff] }
  0xcd   : > { %4249 = vmatmul.mubr.msk.f32.vlgmr.msra.gmra.mrb[0].mxu0 %vm284_vm0, %v957_v13 }
  0xce   : > { %4261 = vmatpush3.msra.mxu0 %v3717_v1  ;;  %v944_v41 = vpop.permute.xlu1 %943  ;;  %v939_v31 = vpop.permute.xlu0 %938  ;;  %4251 = vmatprep.mubr.msk.f32.mxu0 %vm284_vm0, %v958_v14  ;;  %v6485_v14 = vld [vmem:[#allocation9_spill] sm:$0xff] }
  0xcf   : > { %v960_v21 = vmul.f32 %v939_v31, %v5487_v6  ;;  %2289 = vperm.xlu1 %4712, %v5068_v35   ;;  %2361 = vperm.xlu0 %4711, %v5116_v43   ;;  %v961_v1 = vmul.f32 %v944_v41, %v5489_v57  ;;  %v6486_v31 = vld [vmem:[#allocation8_spill] sm:$0xff] }
  0xd0   : > { %4274 = vmatprep.subr.mxu0 %v3734_v33 }
  0xd1   : > { %4252 = vmatmul.mubr.msk.f32.gmra.mrb[2].mxu0 %vm284_vm0, %v959_v58 }
  0xd2   : > { %v954_v32 = vpop.permute.xlu1 %953  ;;  %v949_v40 = vpop.permute.xlu0 %948  ;;  %4254 = vmatprep.mubr.msk.f32.mxu0 %vm284_vm0, %v960_v21 }
  0xd3   : > { %v962_v3 = vmul.f32 %v949_v40, %v5497_v9  ;;  %2294 = vperm.xlu1 %4712, %v5063_v34   ;;  %2366 = vperm.xlu0 %4711, %v5111_v42   ;;  %v963_v20 = vmul.f32 %v954_v32, %v5566_v27  ;;  %v3751_v42 = vld [vmem:[%s6446_s2 + $0x30] sm:$0xff]  ;;  %v6488_v40 = vld [vmem:[#allocation13_spill] sm:$0xff] }
  0xd5   : > { %4255 = vmatmul.mubr.msk.f32.gmra.mrb[4].mxu0 %vm284_vm0, %v961_v1 }
  0xd6   : > { %v1275_v35 = vpop.permute.xlu1 %1274  ;;  %v1270_v43 = vpop.permute.xlu0 %1269  ;;  %4257 = vmatprep.mubr.msk.f32.mxu0 %vm284_vm0, %v962_v3 }
  0xd7   : > { %2416 = vperm.xlu1 %4712, %v5123_v44   ;;  %2411 = vperm.xlu0 %4711, %v5128_v45   ;;  %v1307_v10 = vmul.f32 %v1270_v43, %v5504_v18  ;;  %v1308_v5 = vmul.f32 %v1275_v35, %v5506_v25  ;;  %v6489_v35 = vld [vmem:[#allocation10_spill] sm:$0xff]  ;;  %v6490_v43 = vld [vmem:[#allocation12_spill] sm:$0xff] }
  0xd9   : > { %4258 = vmatmul.mubr.msk.f32.gmra.mrb[6].mxu0 %vm284_vm0, %v963_v20 }
  0xda   : > { %v1285_v4 = vpop.permute.xlu1 %1284  ;;  %v1280_v34 = vpop.permute.xlu0 %1279  ;;  %4262 = vmatprep.mubr.msk.f32.mxu0 %vm284_vm0, %v5426_v24 }
  0xdb   : > { %2426 = vperm.xlu1 %4712, %v5135_v46   ;;  %2421 = vperm.xlu0 %4711, %v5140_v47   ;;  %v1309_v39 = vmul.f32 %v1280_v34, %v5514_v28  ;;  %v1310_v19 = vmul.f32 %v1285_v4, %v5516_v37 }
  0xdd   : > { %4263 = vmatmul.mubr.msk.f32.vlgmr.msra.gmra.mrb[0].mxu0 %vm284_vm0, %v5422_v23 }
  0xde   : > { %4275 = vmatpush3.msra.mxu0 %v3734_v33  ;;  %v1295_v44 = vpop.permute.xlu1 %1294  ;;  %v1290_v45 = vpop.permute.xlu0 %1289  ;;  %4265 = vmatprep.mubr.msk.f32.mxu0 %vm284_vm0, %v5433_v63 }
  0xdf   : > { %2436 = vperm.xlu1 %4712, %v5147_v48   ;;  %2431 = vperm.xlu0 %4711, %v5152_v49   ;;  %v5597_v49 = vld [vmem:[#allocation2 + $0x48] sm:$0xff]  ;;  %v1312_v56 = vmul.f32 %v1295_v44, %v5529_v26  ;;  %v6492_v44 = vld [vmem:[#allocation15_spill] sm:$0xff] }
  0xe0   : > { %4288 = vmatprep.subr.mxu0 %v3751_v42 }
  0xe1   : > { %4266 = vmatmul.mubr.msk.f32.gmra.mrb[2].mxu0 %vm284_vm0, %v5435_v11 }
  0xe2   : > { %v1305_v46 = vpop.permute.xlu1 %1304  ;;  %v1300_v47 = vpop.permute.xlu0 %1299  ;;  %4268 = vmatprep.mubr.msk.f32.mxu0 %vm284_vm0, %v5447_v22 }
  0xe3   : > { %2446 = vperm.xlu1 %4712, %v5159_v50   ;;  %2441 = vperm.xlu0 %4711, %v5164_v51   ;;  %v1314_v13 = vmul.f32 %v1305_v46, %v5623_v29 }
  0xe5   : > { %4269 = vmatmul.mubr.msk.f32.gmra.mrb[4].mxu0 %vm284_vm0, %v5449_v59 }
  0xe6   : > { %v1479_v24 = vpop.permute.xlu1 %1478  ;;  %v1474_v48 = vpop.permute.xlu0 %1473  ;;  %4271 = vmatprep.mubr.msk.f32.mxu0 %vm284_vm0, %v5457_v0 }
  0xe7   : > { %2483 = vperm.xlu1 %4712, %v5176_v53   ;;  %2555 = vperm.xlu0 %4711, %v5224_v61   ;;  %v3768_v53 = vld [vmem:[%s6446_s2 + $0x38] sm:$0xff]  ;;  %v1512_v41 = vmul.f32 %v1479_v24, %v5474_v15  ;;  %v6494_v24 = vld [vmem:[#allocation14_spill] sm:$0xff] }
  0xe8   : > { %v6487_v15 = vld [vmem:[#allocation11_spill] sm:$0xff] }
  0xe9   : > { %4272 = vmatmul.mubr.msk.f32.gmra.mrb[6].mxu0 %vm284_vm0, %v5597_v49 }
  0xea   : > { %v1489_v50 = vpop.permute.xlu1 %1488  ;;  %v1484_v51 = vpop.permute.xlu0 %1483  ;;  %4276 = vmatprep.mubr.msk.f32.mxu0 %vm284_vm0, %v1307_v10 }
  0xeb   : > { %2488 = vperm.xlu1 %4712, %v5171_v52   ;;  %2560 = vperm.xlu0 %4711, %v5219_v60   ;;  %v1311_v52 = vmul.f32 %v1290_v45, %v5527_v36  ;;  %v1513_v58 = vmul.f32 %v1484_v51, %v5476_v7  ;;  %v1514_v32 = vmul.f32 %v1489_v50, %v5487_v6  ;;  %v1461_v6 = vld [vmem:[#allocation2 + $0x4f] sm:$0xff]  ;;  %v6495_v51 = vld [vmem:[#allocation20_spill] sm:$0xff] }
  0xed   : > { %4277 = vmatmul.mubr.msk.f32.vlgmr.msra.gmra.mrb[0].mxu0 %vm284_vm0, %v1308_v5  ;;  %v6496_v5 = vld [vmem:[#allocation16_spill] sm:$0xff] }
  0xee   : > { %4289 = vmatpush3.msra.mxu0 %v3751_v42  ;;  %v1499_v61 = vpop.permute.xlu1 %1498  ;;  %v1494_v18 = vpop.permute.xlu0 %1493  ;;  %4279 = vmatprep.mubr.msk.f32.mxu0 %vm284_vm0, %v1309_v39  ;;  %v6491_v42 = vld [vmem:[#allocation18_spill] sm:$0xff]  ;;  %v3846_v39 = vld [vmem:[%s6444_s0 + $0x218] sm:$0xff] }
  0xef   : > { %2493 = vperm.xlu1 %4712, %v5188_v55   ;;  %2565 = vperm.xlu0 %4711, %v5245_v17   ;;  %v1313_v55 = vmul.f32 %v1300_v47, %v5537_v30  ;;  %v1516_v3 = vmul.f32 %v1499_v61, %v5497_v9  ;;  %v6493_v47 = vld [vmem:[#allocation17_spill] sm:$0xff] }
  0xf0   : > { %4302 = vmatprep.subr.mxu0 %v3768_v53 }
  0xf1   : > { %4280 = vmatmul.mubr.msk.f32.gmra.mrb[2].mxu0 %vm284_vm0, %v1310_v19  ;;  %v1665_v19 = vld [vmem:[#allocation2 + $0x50] sm:$0xff] }
  0xf2   : > { %v1509_v60 = vpop.permute.xlu1 %1508  ;;  %v1504_v8 = vpop.permute.xlu0 %1503  ;;  %4282 = vmatprep.mubr.msk.f32.mxu0 %vm284_vm0, %v1311_v52 }
  0xf3   : > { %2498 = vperm.xlu1 %4712, %v5183_v54   ;;  %2570 = vperm.xlu0 %4711, %v5229_v62   ;;  %v1511_v54 = vmul.f32 %v1474_v48, %v5466_v12  ;;  %v1517_v20 = vmul.f32 %v1504_v8, %v5566_v27  ;;  %v1518_v34 = vmul.f32 %v1509_v60, %v1461_v6  ;;  %v2097_v60 = vld [vmem:[#allocation3 + $0x7] sm:$0xff] }
  0xf5   : > { %4283 = vmatmul.mubr.msk.f32.gmra.mrb[4].mxu0 %vm284_vm0, %v1312_v56 }
  0xf6   : > { %v1683_v17 = vpop.permute.xlu1 %1682  ;;  %v1678_v38 = vpop.permute.xlu0 %1677  ;;  %4285 = vmatprep.mubr.msk.f32.mxu0 %vm284_vm0, %v1313_v55 }
  0xf7   : > { %2503 = vperm.xlu1 %4712, %v6485_v14   ;;  %2575 = vperm.xlu0 %4711, %v5271_v16   ;;  %v3785_v16 = vld [vmem:[%s6446_s2 + $0x40] sm:$0xff]  ;;  %v1715_v9 = vmul.f32 %v1678_v38, %v5422_v23  ;;  %v1716_v27 = vmul.f32 %v1683_v17, %v5433_v63 }
  0xf8   : > { %v5689_v38 = vld [vmem:[#allocation3] sm:$0xff] }
  0xf9   : > { %4286 = vmatmul.mubr.msk.f32.gmra.mrb[6].mxu0 %vm284_vm0, %v1314_v13  ;;  %6498 = vst [vmem:[#allocation9_spill] sm:$0xff] %v5689_v38 }
  0xfa   : > { %v1693_v62 = vpop.permute.xlu1 %1692  ;;  %v1688_v33 = vpop.permute.xlu0 %1687  ;;  %4290 = vmatprep.mubr.msk.f32.mxu0 %vm284_vm0, %v1511_v54  ;;  %v2884_v54 = vld [vmem:[%s6448_s4 + $0x418] sm:$0xff] }
  0xfb   : > { %2508 = vperm.xlu1 %4712, %v6486_v31   ;;  %2580 = vperm.xlu0 %4711, %v5260_v2   ;;  %v1515_v2 = vmul.f32 %v1494_v18, %v5489_v57  ;;  %v1717_v48 = vmul.f32 %v1688_v33, %v5435_v11  ;;  %v1718_v23 = vmul.f32 %v1693_v62, %v5447_v22  ;;  %v6497_v18 = vld [vmem:[#allocation19_spill] sm:$0xff]  ;;  %v2881_v22 = vld [vmem:[%s6448_s4 + $0x400] sm:$0xff] }
  0xfd   : > { %4291 = vmatmul.mubr.msk.f32.vlgmr.msra.gmra.mrb[0].mxu0 %vm284_vm0, %v1512_v41 }
  0xfe   : > { %4303 = vmatpush3.msra.mxu0 %v3768_v53  ;;  %v1703_v12 = vpop.permute.xlu1 %1702  ;;  %v1698_v21 = vpop.permute.xlu0 %1697  ;;  %4293 = vmatprep.mubr.msk.f32.mxu0 %vm284_vm0, %v1513_v58 }
  0xff   : > { %2513 = vperm.xlu1 %4712, %v6487_v15   ;;  %2585 = vperm.xlu0 %4711, %v6488_v40   ;;  %v1719_v63 = vmul.f32 %v1698_v21, %v5449_v59  ;;  %v1720_v61 = vmul.f32 %v1703_v12, %v5457_v0  ;;  %v2882_v59 = vld [vmem:[%s6448_s4 + $0x408] sm:$0xff] }
 0x100   : > { %4316 = vmatprep.subr.mxu0 %v3785_v16  ;;  %v5684_v8 = vpack.c.bf16 %v2882_v59, %v2881_v22  ;;  %v2896_v22 = vld [vmem:[%s6448_s4 + $0x478] sm:$0xff] }
 0x101   : > { %4294 = vmatmul.mubr.msk.f32.gmra.mrb[2].mxu0 %vm284_vm0, %v1514_v32 }
 0x102   : > { %v1713_v7 = vpop.permute.xlu1 %1712  ;;  %v1708_v1 = vpop.permute.xlu0 %1707  ;;  %4296 = vmatprep.mubr.msk.f32.mxu0 %vm284_vm0, %v1515_v2  ;;  %v2885_v2 = vld [vmem:[%s6448_s4 + $0x420] sm:$0xff] }
 0x103   : > { %2518 = vperm.xlu1 %4712, %v6489_v35   ;;  %2590 = vperm.xlu0 %4711, %v6490_v43   ;;  %v1721_v52 = vmul.f32 %v1708_v1, %v5597_v49  ;;  %v1722_v55 = vmul.f32 %v1713_v7, %v1665_v19  ;;  %v2883_v49 = vld [vmem:[%s6448_s4 + $0x410] sm:$0xff]  ;;  %v2886_v7 = vld [vmem:[%s6448_s4 + $0x428] sm:$0xff]  ;;  %v2888_v35 = vld [vmem:[%s6448_s4 + $0x438] sm:$0xff] }
 0x104   : > { %v5702_v33 = vpack.c.bf16 %v2884_v54, %v2883_v49  ;;  %v5743_v1 = vpack.c.bf16 %v2886_v7, %v2885_v2  ;;  %v2791_v54 = vld [vmem:[%s6448_s4 + $0x130] sm:$0xff] }
 0x105   : > { %4297 = vmatmul.mubr.msk.f32.gmra.mrb[4].mxu0 %vm284_vm0, %v1516_v3  ;;  %v2887_v3 = vld [vmem:[%s6448_s4 + $0x430] sm:$0xff] }
 0x106   : > { %v1887_v4 = vpop.permute.xlu1 %1886  ;;  %v1882_v57 = vpop.permute.xlu0 %1881  ;;  %4299 = vmatprep.mubr.msk.f32.mxu0 %vm284_vm0, %v1517_v20  ;;  %v5755_v6 = vpack.c.bf16 %v2888_v35, %v2887_v3  ;;  %v2889_v20 = vld [vmem:[%s6448_s4 + $0x440] sm:$0xff]  ;;  %v2811_v3 = vld [vmem:[%s6448_s4 + $0x1d0] sm:$0xff]  ;;  %v2812_v35 = vld [vmem:[%s6448_s4 + $0x1d8] sm:$0xff] }
 0x107   : > { %2647 = vperm.xlu1 %4712, %v6491_v42   ;;  %2627 = vperm.xlu0 %4711, %v6492_v44   ;;  %v1919_v14 = vmul.f32 %v1882_v57, %v5506_v25  ;;  %v1920_v62 = vmul.f32 %v1887_v4, %v5514_v28  ;;  %v2890_v4 = vld [vmem:[%s6448_s4 + $0x448] sm:$0xff]  ;;  %v2891_v42 = vld [vmem:[%s6448_s4 + $0x450] sm:$0xff]  ;;  %v2892_v44 = vld [vmem:[%s6448_s4 + $0x458] sm:$0xff] }
 0x108   : > { %v5765_v57 = vpack.c.bf16 %v2890_v4, %v2889_v20  ;;  %v4440_v20 = vpack.c.bf16 %v2812_v35, %v2811_v3  ;;  %v2795_v4 = vld [vmem:[%s6448_s4 + $0x150] sm:$0xff] }
 0x109   : > { %4300 = vmatmul.mubr.msk.f32.gmra.mrb[6].mxu0 %vm284_vm0, %v1518_v34 }
 0x10a   : > { %v1897_v45 = vpop.permute.xlu1 %1896  ;;  %v1892_v46 = vpop.permute.xlu0 %1891  ;;  %4304 = vmatprep.mubr.msk.f32.mxu0 %vm284_vm0, %v1715_v9  ;;  %v5777_v9 = vpack.c.bf16 %v2892_v44, %v2891_v42  ;;  %v2796_v42 = vld [vmem:[%s6448_s4 + $0x158] sm:$0xff] }
 0x10b   : > { %2652 = vperm.xlu1 %4712, %v6493_v47   ;;  %2632 = vperm.xlu0 %4711, %v6494_v24   ;;  %v1921_v25 = vmul.f32 %v1892_v46, %v5516_v37  ;;  %v1922_v41 = vmul.f32 %v1897_v45, %v5527_v36  ;;  %v1869_v37 = vld [vmem:[#allocation2 + $0x51] sm:$0xff]  ;;  %v2801_v45 = vld [vmem:[%s6448_s4 + $0x180] sm:$0xff]  ;;  %v2802_v46 = vld [vmem:[%s6448_s4 + $0x188] sm:$0xff]  ;;  %v4442_v44 = vpack.c.bf16 %v2796_v42, %v2795_v4 }
 0x10c   : > { %v2785_v47 = vld [vmem:[%s6448_s4 + $0x100] sm:$0xff]  ;;  %v2786_v24 = vld [vmem:[%s6448_s4 + $0x108] sm:$0xff] }
 0x10d   : > { %4305 = vmatmul.mubr.msk.f32.vlgmr.msra.gmra.mrb[0].mxu0 %vm284_vm0, %v1716_v27  ;;  %v4420_v27 = vpack.c.bf16 %v2802_v46, %v2801_v45  ;;  %v2813_v45 = vld [vmem:[%s6448_s4 + $0x1e0] sm:$0xff]  ;;  %v2814_v46 = vld [vmem:[%s6448_s4 + $0x1e8] sm:$0xff] }
 0x10e   : > { %4317 = vmatpush3.msra.mxu0 %v3785_v16  ;;  %v1907_v10 = vpop.permute.xlu1 %1906  ;;  %v1902_v50 = vpop.permute.xlu0 %1901  ;;  %4307 = vmatprep.mubr.msk.f32.mxu0 %vm284_vm0, %v1717_v48  ;;  %v2893_v48 = vld [vmem:[%s6448_s4 + $0x460] sm:$0xff] }
 0x10f   : > { %2657 = vperm.xlu1 %4712, %v6495_v51   ;;  %2637 = vperm.xlu0 %4711, %v6496_v5   ;;  %v1923_v31 = vmul.f32 %v1902_v50, %v5529_v26  ;;  %v1924_v28 = vmul.f32 %v1907_v10, %v5537_v30  ;;  %v5719_v16 = vpop.f32.mrb[0].mxu1  ;;  %v4422_v50 = vpack.c.bf16 %v2786_v24, %v2785_v47  ;;  %v2803_v5 = vld [vmem:[%s6448_s4 + $0x190] sm:$0xff]  ;;  %v2797_v24 = vld [vmem:[%s6448_s4 + $0x160] sm:$0xff] }
 0x110   : > { %4517 = vmatprep.subr.bf16.mxu0 %v5684_v8  ;;  %6499 = vst [vmem:[#allocation8_spill] sm:$0xff] %v5719_v16  ;;  %v5721_v26 = vpop.f32.mrb[1].mxu1  ;;  %4421 = vmatprep.subr.bf16.mxu1 %v4420_v27  ;;  %v4444_v27 = vpack.c.bf16 %v2814_v46, %v2813_v45  ;;  %v3794_v45 = vld [vmem:[%s6447_s3] ss:$0 sm:$0xff] }
 0x111   : > { %4308 = vmatmul.mubr.msk.f32.gmra.mrb[2].mxu0 %vm284_vm0, %v1718_v23  ;;  %v5725_v21 = vpop.f32.mrb[2].mxu1  ;;  %v2894_v23 = vld [vmem:[%s6448_s4 + $0x468] sm:$0xff] }
 0x112   : > { %v1917_v11 = vpop.permute.xlu1 %1916  ;;  %v1912_v53 = vpop.permute.xlu0 %1911  ;;  %4310 = vmatprep.mubr.msk.f32.mxu0 %vm284_vm0, %v1719_v63  ;;  %6500 = vst [vmem:[#allocation11_spill] sm:$0xff] %v5725_v21  ;;  %v5801_v51 = vpack.c.bf16 %v2894_v23, %v2893_v48  ;;  %v2804_v63 = vld [vmem:[%s6448_s4 + $0x198] sm:$0xff]  ;;  %v2798_v48 = vld [vmem:[%s6448_s4 + $0x168] sm:$0xff]  ;;  %v2815_v23 = vld [vmem:[%s6448_s4 + $0x1f0] sm:$0xff] }
 0x113   : > { %2662 = vperm.xlu1 %4712, %v6497_v18   ;;  %2642 = vperm.xlu0 %4711, %v3846_v39   ;;  %v1925_v58 = vmul.f32 %v1912_v53, %v5623_v29  ;;  %v1926_v36 = vmul.f32 %v1917_v11, %v1869_v37  ;;  %v5727_v32 = vpop.f32.mrb[3].mxu1  ;;  %v4424_v39 = vpack.c.bf16 %v2804_v63, %v2803_v5  ;;  %v2787_v11 = vld [vmem:[%s6448_s4 + $0x110] sm:$0xff]  ;;  %v2788_v53 = vld [vmem:[%s6448_s4 + $0x118] sm:$0xff] }
 0x114   : > { %6501 = vst [vmem:[#allocation13_spill] sm:$0xff] %v5727_v32  ;;  %6502 = vst [vmem:[#allocation10_spill] sm:$0xff] %v5801_v51  ;;  %v4426_v18 = vpack.c.bf16 %v2788_v53, %v2787_v11  ;;  %v2816_v5 = vld [vmem:[%s6448_s4 + $0x1f8] sm:$0xff] }
 0x115   : > { %4311 = vmatmul.mubr.msk.f32.gmra.mrb[4].mxu0 %vm284_vm0, %v1720_v61  ;;  %v2895_v61 = vld [vmem:[%s6448_s4 + $0x470] sm:$0xff]  ;;  %v4448_v63 = vpack.c.bf16 %v2816_v5, %v2815_v23  ;;  %v2800_v11 = vld [vmem:[%s6448_s4 + $0x178] sm:$0xff] }
 0x116   : > { %v2116_v0 = vpop.permute.xlu1 %2115  ;;  %v2188_v56 = vpop.permute.xlu0 %2187  ;;  %4313 = vmatprep.mubr.msk.f32.mxu0 %vm284_vm0, %v1721_v52  ;;  %v5823_v59 = vpack.c.bf16 %v2896_v22, %v2895_v61  ;;  %v2805_v52 = vld [vmem:[%s6448_s4 + $0x1a0] sm:$0xff]  ;;  %v2834_v22 = vld [vmem:[%s6448_s4 + $0x288] sm:$0xff] }
 0x117   : > { %v2153_v17 = vmul.f32 %v2116_v0, %v2097_v60  ;;  %v2225_v13 = vmul.f32 %v5689_v38, %v2188_v56  ;;  %v2806_v60 = vld [vmem:[%s6448_s4 + $0x1a8] sm:$0xff]  ;;  %v2789_v56 = vld [vmem:[%s6448_s4 + $0x120] sm:$0xff] }
 0x118   : > { %6503 = vst [vmem:[#allocation12_spill] sm:$0xff] %v5823_v59  ;;  %v4428_v0 = vpack.c.bf16 %v2806_v60, %v2805_v52 }
 0x119   : > { %4314 = vmatmul.mubr.msk.f32.gmra.mrb[6].mxu0 %vm284_vm0, %v1722_v55  ;;  %3091 = vmatprep.mubr.f32.mxu1 %v2225_v13  ;;  %v2790_v55 = vld [vmem:[%s6448_s4 + $0x128] sm:$0xff]  ;;  %v2807_v13 = vld [vmem:[%s6448_s4 + $0x1b0] sm:$0xff] }
 0x11a   : > { %4318 = vmatprep.mubr.msk.f32.mxu0 %vm284_vm0, %v1919_v14  ;;  %3092 = vmatmul.mubr.f32.vlgmr.msra.gmra.mrb[8].mxu1 %v2153_v17  ;;  %v5723_v12 = vpop.permute.xlu0 %2192  ;;  %v4430_v17 = vpack.c.bf16 %v2790_v55, %v2789_v56  ;;  %v2808_v14 = vld [vmem:[%s6448_s4 + $0x1b8] sm:$0xff] }
 0x11b   : > { %4423 = vmatpush3.bf16.msra.mxu1 %v4422_v50  ;;  %v4432_v49 = vpack.c.bf16 %v2808_v14, %v2807_v13  ;;  %v4446_v50 = vpack.c.bf16 %v2798_v48, %v2797_v24 }
 0x11c   : > { %4425 = vmatprep.subr.bf16.mxu1 %v4424_v39  ;;  %v2799_v39 = vld [vmem:[%s6448_s4 + $0x170] sm:$0xff] }
 0x11d   : > { %4319 = vmatmul.mubr.msk.f32.vlgmr.msra.gmra.mrb[0].mxu0 %vm284_vm0, %v1920_v62  ;;  %v2792_v62 = vld [vmem:[%s6448_s4 + $0x138] sm:$0xff]  ;;  %v4450_v53 = vpack.c.bf16 %v2800_v11, %v2799_v39 }
 0x11e   : > { %4321 = vmatprep.mubr.msk.f32.mxu0 %vm284_vm0, %v1921_v25  ;;  %4519 = vmatpush3.bf16.msra.mxu0 %v5684_v8  ;;  %v5729_v30 = vpop.permute.xlu0 %2197 }
 0x11f   : > { %4521 = vmatprep.subr.bf16.mxu0 %v5702_v33  ;;  %4427 = vmatpush3.bf16.msra.mxu1 %v4426_v18  ;;  %v2833_v18 = vld [vmem:[%s6448_s4 + $0x280] sm:$0xff] }
 0x120   : > { %4429 = vmatprep.subr.bf16.mxu1 %v4428_v0  ;;  %v4452_v52 = vpack.c.bf16 %v2834_v22, %v2833_v18 }
 0x121   : > { %4322 = vmatmul.mubr.msk.f32.gmra.mrb[2].mxu0 %vm284_vm0, %v1922_v41  ;;  %v4434_v41 = vpack.c.bf16 %v2792_v62, %v2791_v54 }
 0x122   : > { %4324 = vmatprep.mubr.msk.f32.mxu0 %vm284_vm0, %v1923_v31  ;;  %4523 = vmatpush3.bf16.msra.mxu0 %v5702_v33  ;;  %v5731_v29 = vpop.permute.xlu0 %2202  ;;  %v2809_v31 = vld [vmem:[%s6448_s4 + $0x1c0] sm:$0xff] }
 0x123   : > { %4525 = vmatprep.subr.bf16.mxu0 %v5743_v1  ;;  %4431 = vmatpush3.bf16.msra.mxu1 %v4430_v17 }
 0x124   : > { %4433 = vmatprep.subr.bf16.mxu1 %v4432_v49  ;;  %v2121_v49 = vpop.permute.xlu1 %2120 }
 0x125   : > { %4325 = vmatmul.mubr.msk.f32.gmra.mrb[4].mxu0 %vm284_vm0, %v1924_v28  ;;  %v2810_v28 = vld [vmem:[%s6448_s4 + $0x1c8] sm:$0xff] }
 0x126   : > { %4327 = vmatprep.mubr.msk.f32.mxu0 %vm284_vm0, %v1925_v58  ;;  %v5733_v15 = vpop.permute.xlu0 %2207  ;;  %4527 = vmatpush3.bf16.msra.mxu0 %v5743_v1  ;;  %v4436_v37 = vpack.c.bf16 %v2810_v28, %v2809_v31  ;;  %v2793_v58 = vld [vmem:[%s6448_s4 + $0x140] sm:$0xff] }
 0x127   : > { %4529 = vmatprep.subr.bf16.mxu0 %v5755_v6  ;;  %4435 = vmatpush3.bf16.msra.mxu1 %v4434_v41 }
 0x128   : > { %4437 = vmatprep.subr.bf16.mxu1 %v4436_v37  ;;  %v5931_v62 = vpop.permute.xlu1 %2125 }
 0x129   : > { %4328 = vmatmul.mubr.msk.f32.gmra.mrb[6].mxu0 %vm284_vm0, %v1926_v36  ;;  %v2794_v36 = vld [vmem:[%s6448_s4 + $0x148] sm:$0xff] }
 0x12a   : > { %v5735_v40 = vpop.permute.xlu0 %2212  ;;  %4531 = vmatpush3.bf16.msra.mxu0 %v5755_v6  ;;  %v4438_v2 = vpack.c.bf16 %v2794_v36, %v2793_v58 }
 0x12b   : > { %4533 = vmatprep.subr.bf16.mxu0 %v5765_v57 }
 0x12c   : > { %4439 = vmatpush3.bf16.msra.mxu1 %v4438_v2  ;;  %v5935_v31 = vpop.permute.xlu1 %2130 }
 0x12d   : > { %4441 = vmatprep.subr.bf16.mxu1 %v4440_v20 }
 0x12e   : > { %v5753_v43 = vpop.permute.xlu0 %2217  ;;  %4535 = vmatpush3.bf16.msra.mxu0 %v5765_v57 }
 0x12f   : > { %4537 = vmatprep.subr.bf16.mxu0 %v5777_v9 }
 0x130   : > { %4443 = vmatpush3.bf16.msra.mxu1 %v4442_v44  ;;  %v5939_v37 = vpop.permute.xlu1 %2135 }
 0x131   : > { %4445 = vmatprep.subr.bf16.mxu1 %v4444_v27 }
 0x132   : > { %v5767_v34 = vpop.permute.xlu0 %2222  ;;  %4539 = vmatpush3.bf16.msra.mxu0 %v5777_v9 }
 0x133   : > { %4541 = vmatprep.subr.bf16.mxu0 %v5801_v51 }
 0x134   : > { %4447 = vmatpush3.bf16.msra.mxu1 %v4446_v50  ;;  %v5943_v36 = vpop.permute.xlu1 %2140 }
 0x135   : > { %4449 = vmatprep.subr.bf16.mxu1 %v4448_v63 }
 0x136   : > { %v5796_v10 = vpop.permute.xlu0 %2331  ;;  %4543 = vmatpush3.bf16.msra.mxu0 %v5801_v51 }
 0x137   : > { %4545 = vmatprep.subr.bf16.mxu0 %v5823_v59 }
 0x138   : > { %4451 = vmatpush3.bf16.msra.mxu1 %v4450_v53  ;;  %v5947_v3 = vpop.permute.xlu1 %2145 }
 0x139   : > { %4453 = vmatprep.subr.bf16.mxu1 %v4452_v52 }
 0x13a   : > { %v5825_v19 = vpop.permute.xlu0 %2336  ;;  %4547 = vmatpush3.bf16.msra.mxu0 %v5823_v59 }
 0x13c   : > { %v5951_v20 = vpop.permute.xlu1 %2150 }
 0x13e   : > { %v5853_v25 = vpop.permute.xlu0 %2341 }
 0x140   : > { %v5958_v24 = vpop.permute.xlu1 %2259 }
 0x142   : > { %v5867_v7 = vpop.permute.xlu0 %2346 }
 0x146   : > { %v5887_v47 = vpop.permute.xlu0 %2351 }
 0x14a   : > { %v5907_v61 = vpop.permute.xlu0 %2356 }
 0x14e   : > { %v5915_v60 = vpop.permute.xlu0 %2361 }
 0x152   : > { %v5917_v0 = vpop.permute.xlu0 %2366 }
 0x156   : > { %v5919_v56 = vpop.permute.xlu0 %2411 }
 0x15a   : > { %v5921_v55 = vpop.permute.xlu0 %2421 }
 0x15e   : > { %v5923_v17 = vpop.permute.xlu0 %2431 }
 0x162   : > { %v5925_v13 = vpop.permute.xlu0 %2441 }
 0x166   : > { %v5927_v14 = vpop.permute.xlu0 %2555 }
 0x16a   : > { %v5929_v54 = vpop.permute.xlu0 %2560 }
 0x16e   : > { %v5933_v41 = vpop.permute.xlu0 %2565 }
 0x172   : > { %v5937_v28 = vpop.permute.xlu0 %2570 }
 0x176   : > { %v5941_v58 = vpop.permute.xlu0 %2575 }
 0x17a   : > { %v5945_v2 = vpop.permute.xlu0 %2580 }
 0x17e   : > { %v5949_v35 = vpop.permute.xlu0 %2585 }
 0x182   : > { %v5953_v4 = vpop.permute.xlu0 %2590 }
 0x183   : > { %6504 = vst [vmem:[#allocation18_spill] sm:$0xff] %v5953_v4 }
 0x186   : > { %v2628_v63 = vpop.permute.xlu0 %2627 }
 0x1ed   : > { %v3988_v42 = vpop.f32.mrb[8].mxu1 }
 0x1ee   : > { %v3989_v44 = vpop.f32.mrb[9].mxu1 }
 0x1ef   : > { %v3990_v46 = vadd.f32 %v3989_v44, %v3988_v42  ;;  %v5971_v42 = vpop.permute.xlu1 %2264 }
 0x1f0   : > { %v4320_v27 = vpop.f32.mrb[0].mxu0 }
 0x1f1   : > { %v5961_v48 = vadd.f32 %v3990_v46, %v5721_v26  ;;  %v2074_v50 = vadd.f32 %v4320_v27, %v3794_v45  ;;  %v2019_v23 = vpop.f32.mrb[1].mxu0 }
 0x1f2   : > { %v2073_v5 = vadd.f32 %v3794_v45, %v2019_v23 }
 0x1f3   : > { %6505 = vst [vmem:[#allocation15_spill] sm:$0xff] %v5961_v48  ;;  %v5963_v39 = vmax.f32 %v2074_v50, 0.0  ;;  %v2633_v50 = vpop.permute.xlu0 %2632  ;;  %v5983_v21 = vpop.permute.xlu1 %2269 }
 0x1f4   : > { %v5965_v11 = vmax.f32 %v2073_v5, 0.0  ;;  %v4323_v53 = vpop.f32.mrb[2].mxu0 }
 0x1f5   : > { %2090 = vst [vmem:[#allocation3 + $0x18] sm:$0xff] %v5963_v39  ;;  %v2076_v18 = vadd.f32 %v4323_v53, %v3794_v45  ;;  %v2029_v22 = vpop.f32.mrb[3].mxu0 }
 0x1f6   : > { %2089 = vst [vmem:[#allocation3 + $0x10] sm:$0xff] %v5965_v11  ;;  %v2075_v52 = vadd.f32 %v3794_v45, %v2029_v22  ;;  %v2226_v26 = vmul.f32 %v5723_v12, %v5965_v11 }
 0x1f7   : > { %v5973_v44 = vmax.f32 %v2076_v18, 0.0  ;;  %v2638_v16 = vpop.permute.xlu0 %2637 }
 0x1f8   : > { %v5975_v46 = vmax.f32 %v2075_v52, 0.0  ;;  %v4326_v27 = vpop.f32.mrb[4].mxu0  ;;  %3096 = vmatprep.mubr.f32.mxu1 %v2226_v26 }
 0x1f9   : > { %2092 = vst [vmem:[#allocation3 + $0x28] sm:$0xff] %v5973_v44  ;;  %v2078_v23 = vadd.f32 %v4326_v27, %v3794_v45  ;;  %v2039_v5 = vpop.f32.mrb[5].mxu0 }
 0x1fa   : > { %2091 = vst [vmem:[#allocation3 + $0x20] sm:$0xff] %v5975_v46  ;;  %v2077_v53 = vadd.f32 %v3794_v45, %v2039_v5 }
 0x1fb   : > { %v5979_v22 = vmax.f32 %v2078_v23, 0.0  ;;  %v2227_v23 = vmul.f32 %v5729_v30, %v5963_v39 }
 0x1fc   : > { %v5981_v48 = vmax.f32 %v2077_v53, 0.0  ;;  %v4329_v12 = vpop.f32.mrb[6].mxu0 }
 0x1fd   : > { %2094 = vst [vmem:[#allocation3 + $0x38] sm:$0xff] %v5979_v22  ;;  %v2080_v18 = vadd.f32 %v4329_v12, %v3794_v45  ;;  %v2049_v52 = vpop.f32.mrb[7].mxu0  ;;  %v2098_v26 = vld [vmem:[#allocation3 + $0xf] sm:$0xff]  ;;  %v5991_v5 = vld [vmem:[#allocation3 + $0x17] sm:$0xff] }
 0x1fe   : > { %2093 = vst [vmem:[#allocation3 + $0x30] sm:$0xff] %v5981_v48  ;;  %v2079_v32 = vadd.f32 %v3794_v45, %v2049_v52  ;;  %v2154_v27 = vmul.f32 %v2121_v49, %v2098_v26  ;;  %v2155_v45 = vmul.f32 %v5931_v62, %v5991_v5 }
 0x1ff   : > { %v5987_v59 = vmax.f32 %v2080_v18, 0.0  ;;  %v6005_v18 = vpop.permute.xlu1 %2274 }
 0x200   : > { %v5993_v53 = vmax.f32 %v2079_v32, 0.0  ;;  %3097 = vmatmul.mubr.f32.gmra.mrb[10].mxu1 %v2154_v27  ;;  %v2228_v32 = vmul.f32 %v5731_v29, %v5975_v46  ;;  %v2643_v27 = vpop.permute.xlu0 %2642  ;;  %v2229_v29 = vmul.f32 %v5733_v15, %v5973_v44 }
 0x201   : > { %2096 = vst [vmem:[#allocation3 + $0x48] sm:$0xff] %v5987_v59  ;;  %3101 = vmatprep.mubr.f32.mxu1 %v2227_v23  ;;  %v5996_v12 = vld [vmem:[#allocation3 + $0x19] sm:$0xff]  ;;  %v5998_v38 = vld [vmem:[#allocation3 + $0x21] sm:$0xff] }
 0x202   : > { %2095 = vst [vmem:[#allocation3 + $0x40] sm:$0xff] %v5993_v53  ;;  %v2665_v49 = vmul.f32 %v2628_v63, %v5996_v12  ;;  %v2666_v30 = vmul.f32 %v2633_v50, %v5998_v38  ;;  %v6009_v52 = vld [vmem:[#allocation3 + $0x1f] sm:$0xff]  ;;  %v6021_v51 = vld [vmem:[#allocation3 + $0x27] sm:$0xff] }
 0x203   : > { %v2156_v50 = vmul.f32 %v5935_v31, %v6009_v52 }
 0x204   : > { %4376 = vmatprep.mubr.f32.mxu0 %v2665_v49  ;;  %3102 = vmatmul.mubr.f32.gmra.mrb[12].mxu1 %v2155_v45  ;;  %v6023_v49 = vpop.permute.xlu1 %2279  ;;  %v2157_v45 = vmul.f32 %v5939_v37, %v6021_v51 }
 0x205   : > { %4377 = vmatmul.mubr.f32.vlgmr.msra.gmra.mrb[8].mxu0 %v2666_v30  ;;  %3106 = vmatprep.mubr.f32.mxu1 %v2228_v32  ;;  %v6011_v23 = vld [vmem:[#allocation3 + $0x29] sm:$0xff]  ;;  %v6013_v63 = vld [vmem:[#allocation3 + $0x31] sm:$0xff]  ;;  %v2231_v32 = vmul.f32 %v5753_v43, %v5979_v22  ;;  %v2817_v43 = vld [vmem:[%s6448_s4 + $0x200] sm:$0xff] }
 0x206   : > { %v2667_v62 = vmul.f32 %v2638_v16, %v6011_v23  ;;  %v2668_v4 = vmul.f32 %v2643_v27, %v6013_v63  ;;  %v2230_v16 = vmul.f32 %v5735_v40, %v5981_v48  ;;  %v6029_v31 = vld [vmem:[#allocation3 + $0x2f] sm:$0xff]  ;;  %v2232_v40 = vmul.f32 %v5767_v34, %v5993_v53 }
 0x207   : > { %v2158_v15 = vmul.f32 %v5943_v36, %v6029_v31  ;;  %v2241_v34 = vld [vmem:[#allocation3 + $0x9] sm:$0xff] }
 0x208   : > { %4379 = vmatprep.mubr.f32.mxu0 %v2667_v62  ;;  %3107 = vmatmul.mubr.f32.gmra.mrb[14].mxu1 %v2156_v50  ;;  %v6033_v30 = vpop.permute.xlu1 %2284  ;;  %v2369_v50 = vmul.f32 %v5796_v10, %v2098_v26  ;;  %v2820_v10 = vld [vmem:[%s6448_s4 + $0x218] sm:$0xff] }
 0x209   : > { %4380 = vmatmul.mubr.f32.gmra.mrb[10].mxu0 %v2668_v4  ;;  %3111 = vmatprep.mubr.f32.mxu1 %v2229_v29  ;;  %v6037_v4 = vld [vmem:[#allocation3 + $0x37] sm:$0xff]  ;;  %v6043_v27 = vld [vmem:[#allocation3 + $0x3f] sm:$0xff] }
 0x20a   : > { %v2159_v37 = vmul.f32 %v5947_v3, %v6037_v4  ;;  %v2160_v36 = vmul.f32 %v5951_v20, %v6043_v27  ;;  %v2818_v3 = vld [vmem:[%s6448_s4 + $0x208] sm:$0xff]  ;;  %v2835_v29 = vld [vmem:[%s6448_s4 + $0x290] sm:$0xff] }
 0x20b   : > { %v4454_v20 = vpack.c.bf16 %v2818_v3, %v2817_v43 }
 0x20c   : > { %3112 = vmatmul.mubr.f32.gmra.mrb[16].mxu1 %v2157_v45  ;;  %v6045_v62 = vpop.permute.xlu1 %2289  ;;  %v2836_v45 = vld [vmem:[%s6448_s4 + $0x298] sm:$0xff] }
 0x20d   : > { %3116 = vmatprep.mubr.f32.mxu1 %v2230_v16  ;;  %v2297_v16 = vmul.f32 %v5958_v24, %v2241_v34  ;;  %v2837_v24 = vld [vmem:[%s6448_s4 + $0x2a0] sm:$0xff]  ;;  %v2822_v34 = vld [vmem:[%s6448_s4 + $0x228] sm:$0xff] }
 0x210   : > { %3117 = vmatmul.mubr.f32.gmra.mrb[18].mxu1 %v2158_v15  ;;  %v4456_v15 = vpack.c.bf16 %v2836_v45, %v2835_v29  ;;  %v6069_v26 = vpop.permute.xlu1 %2294  ;;  %v2371_v29 = vmul.f32 %v5853_v25, %v6009_v52  ;;  %v2839_v45 = vld [vmem:[%s6448_s4 + $0x2b0] sm:$0xff] }
 0x211   : > { %3121 = vmatprep.mubr.f32.mxu1 %v2231_v32  ;;  %v2819_v32 = vld [vmem:[%s6448_s4 + $0x210] sm:$0xff] }
 0x212   : > { %v4458_v43 = vpack.c.bf16 %v2820_v10, %v2819_v32  ;;  %v2823_v25 = vld [vmem:[%s6448_s4 + $0x230] sm:$0xff]  ;;  %v2824_v10 = vld [vmem:[%s6448_s4 + $0x238] sm:$0xff] }
 0x214   : > { %3122 = vmatmul.mubr.f32.gmra.mrb[20].mxu1 %v2159_v37  ;;  %v2370_v37 = vmul.f32 %v5825_v19, %v5991_v5  ;;  %v2821_v19 = vld [vmem:[%s6448_s4 + $0x220] sm:$0xff] }
 0x215   : > { %3126 = vmatprep.mubr.f32.mxu1 %v2232_v40  ;;  %v6073_v40 = vld [vmem:[#allocation3 + $0x11] sm:$0xff] }
 0x216   : > { %v2298_v3 = vmul.f32 %v5971_v42, %v6073_v40  ;;  %v2840_v42 = vld [vmem:[%s6448_s4 + $0x2b8] sm:$0xff] }
 0x217   : > { %v4464_v32 = vpack.c.bf16 %v2840_v42, %v2839_v45  ;;  %v2301_v42 = vmul.f32 %v6011_v23, %v6023_v49  ;;  %v2846_v49 = vld [vmem:[%s6448_s4 + $0x2e8] sm:$0xff] }
 0x218   : > { %3127 = vmatmul.mubr.f32.gmra.mrb[22].mxu1 %v2160_v36  ;;  %v2838_v36 = vld [vmem:[%s6448_s4 + $0x2a8] sm:$0xff] }
 0x219   : > { %3196 = vmatprep.mubr.f32.mxu1 %v2369_v50  ;;  %v4460_v50 = vpack.c.bf16 %v2838_v36, %v2837_v24  ;;  %v2841_v24 = vld [vmem:[%s6448_s4 + $0x2c0] sm:$0xff]  ;;  %v4466_v36 = vpack.c.bf16 %v2824_v10, %v2823_v25 }
 0x21a   : > { %v2845_v25 = vld [vmem:[%s6448_s4 + $0x2e0] sm:$0xff] }
 0x21c   : > { %3197 = vmatmul.mubr.f32.vlgmr.msra.gmra.mrb[24].mxu1 %v2297_v16  ;;  %v4462_v16 = vpack.c.bf16 %v2822_v34, %v2821_v19  ;;  %v2373_v34 = vmul.f32 %v5887_v47, %v6029_v31  ;;  %v2827_v47 = vld [vmem:[%s6448_s4 + $0x250] sm:$0xff] }
 0x21d   : > { %4455 = vmatpush3.bf16.msra.mxu1 %v4454_v20  ;;  %3201 = vmatprep.mubr.f32.mxu1 %v2370_v37  ;;  %v6097_v20 = vpop.permute.xlu1 %2416  ;;  %v2372_v37 = vmul.f32 %v5867_v7, %v6021_v51  ;;  %v2825_v7 = vld [vmem:[%s6448_s4 + $0x240] sm:$0xff] }
 0x21e   : > { %4457 = vmatprep.subr.bf16.mxu1 %v4456_v15  ;;  %v2299_v15 = vmul.f32 %v5996_v12, %v5983_v21  ;;  %v2842_v21 = vld [vmem:[%s6448_s4 + $0x2c8] sm:$0xff] }
 0x220   : > { %3202 = vmatmul.mubr.f32.gmra.mrb[26].mxu1 %v2298_v3  ;;  %v4468_v3 = vpack.c.bf16 %v2842_v21, %v2841_v24  ;;  %v2302_v24 = vmul.f32 %v6013_v63, %v6033_v30  ;;  %v4476_v21 = vpack.c.bf16 %v2846_v49, %v2845_v25  ;;  %v2848_v30 = vld [vmem:[%s6448_s4 + $0x2f8] sm:$0xff] }
 0x221   : > { %4459 = vmatpush3.bf16.msra.mxu1 %v4458_v43  ;;  %3206 = vmatprep.mubr.f32.mxu1 %v2371_v29  ;;  %v2300_v43 = vmul.f32 %v5998_v38, %v6005_v18  ;;  %v6123_v19 = vpop.permute.xlu1 %2426  ;;  %v2843_v29 = vld [vmem:[%s6448_s4 + $0x2d0] sm:$0xff]  ;;  %v2844_v18 = vld [vmem:[%s6448_s4 + $0x2d8] sm:$0xff] }
 0x222   : > { %4461 = vmatprep.subr.bf16.mxu1 %v4460_v50  ;;  %v2826_v50 = vld [vmem:[%s6448_s4 + $0x248] sm:$0xff] }
 0x223   : > { %v4470_v45 = vpack.c.bf16 %v2826_v50, %v2825_v7  ;;  %v2847_v7 = vld [vmem:[%s6448_s4 + $0x2f0] sm:$0xff]  ;;  %v6169_v50 = vld [vmem:[#allocation3 + $0x47] sm:$0xff] }
 0x224   : > { %3207 = vmatmul.mubr.f32.gmra.mrb[28].mxu1 %v2299_v15  ;;  %v2828_v15 = vld [vmem:[%s6448_s4 + $0x258] sm:$0xff] }
 0x225   : > { %4463 = vmatpush3.bf16.msra.mxu1 %v4462_v16  ;;  %3211 = vmatprep.mubr.f32.mxu1 %v2372_v37  ;;  %v4472_v16 = vpack.c.bf16 %v2844_v18, %v2843_v29  ;;  %v6149_v10 = vpop.permute.xlu1 %2436  ;;  %v4474_v37 = vpack.c.bf16 %v2828_v15, %v2827_v47  ;;  %v4480_v29 = vpack.c.bf16 %v2848_v30, %v2847_v7  ;;  %v2831_v18 = vld [vmem:[%s6448_s4 + $0x270] sm:$0xff]  ;;  %v6183_v47 = vld [vmem:[#allocation3 + $0x41] sm:$0xff] }
 0x226   : > { %4465 = vmatprep.subr.bf16.mxu1 %v4464_v32  ;;  %v2374_v32 = vmul.f32 %v5907_v61, %v6037_v4  ;;  %v2829_v61 = vld [vmem:[%s6448_s4 + $0x260] sm:$0xff]  ;;  %v2866_v15 = vld [vmem:[%s6448_s4 + $0x388] sm:$0xff]  ;;  %v2304_v25 = vmul.f32 %v6069_v26, %v6183_v47  ;;  %v2868_v26 = vld [vmem:[%s6448_s4 + $0x398] sm:$0xff]  ;;  %v2450_v7 = vmul.f32 %v5996_v12, %v6097_v20 }
 0x227   : > { %v2869_v30 = vld [vmem:[%s6448_s4 + $0x3a0] sm:$0xff]  ;;  %v2854_v12 = vld [vmem:[%s6448_s4 + $0x328] sm:$0xff] }
 0x228   : > { %3212 = vmatmul.mubr.f32.gmra.mrb[30].mxu1 %v2300_v43  ;;  %v2375_v43 = vmul.f32 %v5915_v60, %v6043_v27 }
 0x229   : > { %4467 = vmatpush3.bf16.msra.mxu1 %v4466_v36  ;;  %3216 = vmatprep.mubr.f32.mxu1 %v2373_v34  ;;  %v2830_v36 = vld [vmem:[%s6448_s4 + $0x268] sm:$0xff] }
 0x22a   : > { %4469 = vmatprep.subr.bf16.mxu1 %v4468_v3  ;;  %v6161_v3 = vld [vmem:[#allocation3 + $0x39] sm:$0xff]  ;;  %v4478_v34 = vpack.c.bf16 %v2830_v36, %v2829_v61 }
 0x22b   : > { %v2303_v60 = vmul.f32 %v6045_v62, %v6161_v3  ;;  %v2865_v62 = vld [vmem:[%s6448_s4 + $0x380] sm:$0xff] }
 0x22c   : > { %3217 = vmatmul.mubr.f32.gmra.mrb[32].mxu1 %v2301_v42  ;;  %v6179_v42 = vpop.permute.xlu1 %2446  ;;  %v4484_v49 = vpack.c.bf16 %v2866_v15, %v2865_v62 }
 0x22d   : > { %4471 = vmatpush3.bf16.msra.mxu1 %v4470_v45  ;;  %3221 = vmatprep.mubr.f32.mxu1 %v2374_v32  ;;  %v2832_v45 = vld [vmem:[%s6448_s4 + $0x278] sm:$0xff] }
 0x22e   : > { %4473 = vmatprep.subr.bf16.mxu1 %v4472_v16  ;;  %v2376_v16 = vmul.f32 %v5917_v0, %v6169_v50  ;;  %v4482_v32 = vpack.c.bf16 %v2832_v45, %v2831_v18  ;;  %v2849_v0 = vld [vmem:[%s6448_s4 + $0x300] sm:$0xff]  ;;  %v2451_v45 = vmul.f32 %v5998_v38, %v5921_v55  ;;  %v2856_v38 = vld [vmem:[%s6448_s4 + $0x338] sm:$0xff]  ;;  %v2452_v55 = vmul.f32 %v6011_v23, %v6123_v19  ;;  %v2858_v19 = vld [vmem:[%s6448_s4 + $0x348] sm:$0xff] }
 0x22f   : > { %v2853_v18 = vld [vmem:[%s6448_s4 + $0x320] sm:$0xff] }
 0x230   : > { %3222 = vmatmul.mubr.f32.gmra.mrb[34].mxu1 %v2302_v24  ;;  %v2449_v24 = vmul.f32 %v5919_v56, %v6073_v40  ;;  %v6207_v61 = vpop.permute.xlu1 %2483  ;;  %v2851_v56 = vld [vmem:[%s6448_s4 + $0x310] sm:$0xff]  ;;  %v2852_v40 = vld [vmem:[%s6448_s4 + $0x318] sm:$0xff]  ;;  %v4494_v62 = vpack.c.bf16 %v2854_v12, %v2853_v18  ;;  %v2857_v23 = vld [vmem:[%s6448_s4 + $0x340] sm:$0xff]  ;;  %v2455_v12 = vmul.f32 %v5925_v13, %v6183_v47 }
 0x231   : > { %4475 = vmatpush3.bf16.msra.mxu1 %v4474_v37  ;;  %3226 = vmatprep.mubr.f32.mxu1 %v2375_v43  ;;  %v2850_v37 = vld [vmem:[%s6448_s4 + $0x308] sm:$0xff]  ;;  %v2861_v18 = vld [vmem:[%s6448_s4 + $0x360] sm:$0xff]  ;;  %v2863_v13 = vld [vmem:[%s6448_s4 + $0x370] sm:$0xff] }
 0x232   : > { %4477 = vmatprep.subr.bf16.mxu1 %v4476_v21  ;;  %v2867_v21 = vld [vmem:[%s6448_s4 + $0x390] sm:$0xff]  ;;  %v4486_v36 = vpack.c.bf16 %v2850_v37, %v2849_v0 }
 0x233   : > { %v4488_v43 = vpack.c.bf16 %v2868_v26, %v2867_v21  ;;  %v2453_v21 = vmul.f32 %v6013_v63, %v5923_v17  ;;  %v2875_v26 = vld [vmem:[%s6448_s4 + $0x3d0] sm:$0xff]  ;;  %v2860_v17 = vld [vmem:[%s6448_s4 + $0x358] sm:$0xff] }
 0x234   : > { %3227 = vmatmul.mubr.f32.gmra.mrb[36].mxu1 %v2303_v60  ;;  %v4490_v60 = vpack.c.bf16 %v2852_v40, %v2851_v56  ;;  %v6230_v20 = vpop.permute.xlu1 %2488  ;;  %v2859_v40 = vld [vmem:[%s6448_s4 + $0x350] sm:$0xff] }
 0x235   : > { %4479 = vmatpush3.bf16.msra.mxu1 %v4478_v34  ;;  %3231 = vmatprep.mubr.f32.mxu1 %v2376_v16  ;;  %v2870_v34 = vld [vmem:[%s6448_s4 + $0x3a8] sm:$0xff]  ;;  %v2872_v16 = vld [vmem:[%s6448_s4 + $0x3b8] sm:$0xff] }
 0x236   : > { %4481 = vmatprep.subr.bf16.mxu1 %v4480_v29  ;;  %v4492_v29 = vpack.c.bf16 %v2870_v34, %v2869_v30  ;;  %v2877_v30 = vld [vmem:[%s6448_s4 + $0x3e0] sm:$0xff]  ;;  %v2878_v34 = vld [vmem:[%s6448_s4 + $0x3e8] sm:$0xff] }
 0x238   : > { %3232 = vmatmul.mubr.f32.gmra.mrb[38].mxu1 %v2304_v25  ;;  %v2873_v25 = vld [vmem:[%s6448_s4 + $0x3c0] sm:$0xff]  ;;  %v6256_v0 = vpop.permute.xlu1 %2493 }
 0x239   : > { %4483 = vmatpush3.bf16.msra.mxu1 %v4482_v32  ;;  %3301 = vmatprep.mubr.f32.mxu1 %v2449_v24  ;;  %v2855_v32 = vld [vmem:[%s6448_s4 + $0x330] sm:$0xff] }
 0x23a   : > { %4485 = vmatprep.subr.bf16.mxu1 %v4484_v49  ;;  %v2874_v49 = vld [vmem:[%s6448_s4 + $0x3c8] sm:$0xff]  ;;  %v4498_v37 = vpack.c.bf16 %v2856_v38, %v2855_v32  ;;  %v2864_v38 = vld [vmem:[%s6448_s4 + $0x378] sm:$0xff] }
 0x23b   : > { %v4500_v24 = vpack.c.bf16 %v2874_v49, %v2873_v25  ;;  %v4514_v25 = vpack.c.bf16 %v2864_v38, %v2863_v13 }
 0x23c   : > { %3302 = vmatmul.mubr.f32.vlgmr.msra.gmra.mrb[40].mxu1 %v5965_v11  ;;  %v2871_v11 = vld [vmem:[%s6448_s4 + $0x3b0] sm:$0xff]  ;;  %v2499_v63 = vpop.permute.xlu1 %2498 }
 0x23d   : > { %4487 = vmatpush3.bf16.msra.mxu1 %v4486_v36  ;;  %3306 = vmatprep.mubr.f32.mxu1 %v2450_v7  ;;  %v4496_v15 = vpack.c.bf16 %v2872_v16, %v2871_v11  ;;  %v2876_v36 = vld [vmem:[%s6448_s4 + $0x3d8] sm:$0xff]  ;;  %v2454_v7 = vmul.f32 %v6149_v10, %v6161_v3  ;;  %v2862_v10 = vld [vmem:[%s6448_s4 + $0x368] sm:$0xff] }
 0x23e   : > { %4489 = vmatprep.subr.bf16.mxu1 %v4488_v43  ;;  %v4502_v43 = vpack.c.bf16 %v2858_v19, %v2857_v23  ;;  %v4504_v56 = vpack.c.bf16 %v2876_v36, %v2875_v26  ;;  %v2880_v11 = vld [vmem:[%s6448_s4 + $0x3f8] sm:$0xff]  ;;  %v6303_v16 = vld [vmem:[#allocation3 + $0x49] sm:$0xff] }
 0x240   : > { %3307 = vmatmul.mubr.f32.gmra.mrb[42].mxu1 %v5963_v39 }
 0x241   : > { %4491 = vmatpush3.bf16.msra.mxu1 %v4490_v60  ;;  %3311 = vmatprep.mubr.f32.mxu1 %v2451_v45  ;;  %v4506_v60 = vpack.c.bf16 %v2860_v17, %v2859_v40  ;;  %v2879_v45 = vld [vmem:[%s6448_s4 + $0x3f0] sm:$0xff] }
 0x242   : > { %4493 = vmatprep.subr.bf16.mxu1 %v4492_v29  ;;  %v4508_v29 = vpack.c.bf16 %v2878_v34, %v2877_v30  ;;  %v4512_v32 = vpack.c.bf16 %v2880_v11, %v2879_v45 }
 0x244   : > { %3312 = vmatmul.mubr.f32.gmra.mrb[44].mxu1 %v5975_v46 }
 0x245   : > { %4495 = vmatpush3.bf16.msra.mxu1 %v4494_v62  ;;  %3316 = vmatprep.mubr.f32.mxu1 %v2452_v55  ;;  %v2504_v62 = vpop.permute.xlu1 %2503  ;;  %v2456_v55 = vmul.f32 %v6179_v42, %v6303_v16  ;;  %v2594_v42 = vmul.f32 %v5929_v54, %v5975_v46  ;;  %v2523_v54 = vmul.f32 %v6256_v0, %v6021_v51 }
 0x246   : > { %4497 = vmatprep.subr.bf16.mxu1 %v4496_v15  ;;  %v4510_v15 = vpack.c.bf16 %v2862_v10, %v2861_v18  ;;  %v2525_v51 = vmul.f32 %v2504_v62, %v6037_v4 }
 0x248   : > { %3317 = vmatmul.mubr.f32.gmra.mrb[46].mxu1 %v5973_v44 }
 0x249   : > { %4499 = vmatpush3.bf16.msra.mxu1 %v4498_v37  ;;  %3321 = vmatprep.mubr.f32.mxu1 %v2453_v21  ;;  %v2509_v49 = vpop.permute.xlu1 %2508  ;;  %v2593_v37 = vmul.f32 %v5927_v14, %v5963_v39  ;;  %v2522_v14 = vmul.f32 %v6230_v20, %v6009_v52  ;;  %v2595_v39 = vmul.f32 %v5933_v41, %v5973_v44  ;;  %v6510_v21 = vld [vmem:[#allocation8_spill] sm:$0xff] }
 0x24a   : > { %4501 = vmatprep.subr.bf16.mxu1 %v4500_v24  ;;  %v2521_v24 = vmul.f32 %v6207_v61, %v5991_v5  ;;  %v2524_v41 = vmul.f32 %v2499_v63, %v6029_v31  ;;  %v6508_v5 = vld [vmem:[#allocation9_spill] sm:$0xff]  ;;  %v6509_v31 = vld [vmem:[#allocation12_spill] sm:$0xff] }
 0x24c   : > { %3322 = vmatmul.mubr.f32.gmra.mrb[48].mxu1 %v5981_v48 }
 0x24d   : > { %4503 = vmatpush3.bf16.msra.mxu1 %v4502_v43  ;;  %3326 = vmatprep.mubr.f32.mxu1 %v2454_v7  ;;  %v2514_v23 = vpop.permute.xlu1 %2513 }
 0x24e   : > { %4505 = vmatprep.subr.bf16.mxu1 %v4504_v56 }
 0x250   : > { %3327 = vmatmul.mubr.f32.gmra.mrb[50].mxu1 %v5979_v22 }
 0x251   : > { %4507 = vmatpush3.bf16.msra.mxu1 %v4506_v60  ;;  %3331 = vmatprep.mubr.f32.mxu1 %v2455_v12  ;;  %v2519_v46 = vpop.permute.xlu1 %2518 }
 0x252   : > { %4509 = vmatprep.subr.bf16.mxu1 %v4508_v29  ;;  %v6512_v29 = vld [vmem:[#allocation11_spill] sm:$0xff] }
 0x254   : > { %3332 = vmatmul.mubr.f32.gmra.mrb[52].mxu1 %v5993_v53 }
 0x255   : > { %4511 = vmatpush3.bf16.msra.mxu1 %v4510_v15  ;;  %3336 = vmatprep.mubr.f32.mxu1 %v2456_v55  ;;  %v2648_v44 = vpop.permute.xlu1 %2647 }
 0x256   : > { %4513 = vmatprep.subr.bf16.mxu1 %v4512_v32 }
 0x258   : > { %3337 = vmatmul.mubr.f32.gmra.mrb[54].mxu1 %v5987_v59 }
 0x259   : > { %4515 = vmatpush3.bf16.msra.mxu1 %v4514_v25  ;;  %3406 = vmatprep.mubr.f32.mxu1 %v2593_v37 }
 0x25a   : > { %4548 = vmatprep.subr.bf16.mxu1 %v5684_v8 }
 0x25c   : > { %3407 = vmatmul.mubr.f32.vlgmr.msra.gmra.mrb[56].mxu1 %v2521_v24 }
 0x25d   : > { %4556 = vmatpush3.bf16.msra.mxu1 %v5684_v8  ;;  %3411 = vmatprep.mubr.f32.mxu1 %v2594_v42  ;;  %v2596_v8 = vmul.f32 %v5937_v28, %v5981_v48  ;;  %v2526_v28 = vmul.f32 %v2509_v49, %v6043_v27  ;;  %v6506_v48 = vld [vmem:[#allocation10_spill] sm:$0xff]  ;;  %v6513_v42 = vld [vmem:[#allocation15_spill] sm:$0xff] }
 0x25e   : > { %4549 = vmatprep.subr.bf16.mxu1 %v5702_v33  ;;  %v2616_v27 = vld [vmem:[#allocation3 + $0x51] sm:$0xff] }
 0x260   : > { %3412 = vmatmul.mubr.f32.gmra.mrb[58].mxu1 %v2522_v14 }
 0x261   : > { %4557 = vmatpush3.bf16.msra.mxu1 %v5702_v33  ;;  %3416 = vmatprep.mubr.f32.mxu1 %v2595_v39  ;;  %v2597_v33 = vmul.f32 %v5941_v58, %v5979_v22  ;;  %v2653_v58 = vpop.permute.xlu1 %2652  ;;  %v6507_v22 = vld [vmem:[#allocation18_spill] sm:$0xff] }
 0x262   : > { %4550 = vmatprep.subr.bf16.mxu1 %v5743_v1 }
 0x264   : > { %3417 = vmatmul.mubr.f32.gmra.mrb[60].mxu1 %v2523_v54 }
 0x265   : > { %4558 = vmatpush3.bf16.msra.mxu1 %v5743_v1  ;;  %3421 = vmatprep.mubr.f32.mxu1 %v2596_v8  ;;  %v2598_v1 = vmul.f32 %v5945_v2, %v5993_v53  ;;  %v2527_v2 = vmul.f32 %v2514_v23, %v6169_v50  ;;  %v2472_v53 = vld [vmem:[#allocation3 + $0x4f] sm:$0xff]  ;;  %v2658_v52 = vpop.permute.xlu1 %2657 }
 0x266   : > { %4551 = vmatprep.subr.bf16.mxu1 %v5755_v6  ;;  %v2671_v50 = vmul.f32 %v2658_v52, %v6303_v16 }
 0x268   : > { %3422 = vmatmul.mubr.f32.gmra.mrb[62].mxu1 %v2524_v41 }
 0x269   : > { %4559 = vmatpush3.bf16.msra.mxu1 %v5755_v6  ;;  %3426 = vmatprep.mubr.f32.mxu1 %v2597_v33  ;;  %v2599_v6 = vmul.f32 %v5949_v35, %v5987_v59  ;;  %v2528_v59 = vmul.f32 %v2519_v46, %v2472_v53  ;;  %v2669_v35 = vmul.f32 %v2648_v44, %v6161_v3  ;;  %v2663_v4 = vpop.permute.xlu1 %2662 }
 0x26a   : > { %4552 = vmatprep.subr.bf16.mxu1 %v5765_v57  ;;  %v2672_v61 = vmul.f32 %v2663_v4, %v2616_v27 }
 0x26c   : > { %3427 = vmatmul.mubr.f32.gmra.mrb[64].mxu1 %v2525_v51 }
 0x26d   : > { %4560 = vmatpush3.bf16.msra.mxu1 %v5765_v57  ;;  %3431 = vmatprep.mubr.f32.mxu1 %v2598_v1  ;;  %v2600_v57 = vmul.f32 %v6508_v5, %v6507_v22 }
 0x26e   : > { %4553 = vmatprep.subr.bf16.mxu1 %v5777_v9 }
 0x270   : > { %3432 = vmatmul.mubr.f32.gmra.mrb[66].mxu1 %v2526_v28 }
 0x271   : > { %4561 = vmatpush3.bf16.msra.mxu1 %v5777_v9  ;;  %3436 = vmatprep.mubr.f32.mxu1 %v2599_v6  ;;  %v2670_v9 = vmul.f32 %v2653_v58, %v6183_v47  ;;  %v6511_v47 = vld [vmem:[#allocation13_spill] sm:$0xff] }
 0x272   : > { %4554 = vmatprep.subr.bf16.mxu1 %v6506_v48 }
 0x274   : > { %3437 = vmatmul.mubr.f32.gmra.mrb[68].mxu1 %v2527_v2 }
 0x275   : > { %4562 = vmatpush3.bf16.msra.mxu1 %v6506_v48  ;;  %3441 = vmatprep.mubr.f32.mxu1 %v2600_v57 }
 0x276   : > { %4555 = vmatprep.subr.bf16.mxu1 %v6509_v31 }
 0x278   : > { %3442 = vmatmul.mubr.f32.gmra.mrb[70].mxu1 %v2528_v59 }
 0x279   : > { %4563 = vmatpush3.bf16.msra.mxu1 %v6509_v31  ;;  %4382 = vmatprep.mubr.f32.mxu1 %v2669_v35 }
 0x27c   : > { %4383 = vmatmul.mubr.f32.vlgmr.msra.gmra.mrb[4].mxu1 %v2670_v9 }
 0x27d   : > { %4385 = vmatprep.mubr.f32.mxu1 %v2671_v50 }
 0x280   : > { %4386 = vmatmul.mubr.f32.gmra.mrb[6].mxu1 %v2672_v61 }
 0x2d3   : > { %v3991_v20 = vpop.f32.mrb[10].mxu1 }
 0x2d4   : > { %v3992_v0 = vpop.f32.mrb[11].mxu1 }
 0x2d5   : > { %v3993_v19 = vadd.f32 %v3992_v0, %v3991_v20 }
 0x2d7   : > { %v3099_v26 = vadd.f32 %v6510_v21, %v3993_v19  ;;  %v3994_v3 = vpop.f32.mrb[12].mxu1 }
 0x2d8   : > { %v6361_v36 = vpop.f32.mrb[8].mxu0  ;;  %v3995_v43 = vpop.f32.mrb[13].mxu1 }
 0x2d9   : > { %v3996_v56 = vadd.f32 %v3995_v43, %v3994_v3  ;;  %v6363_v40 = vpop.f32.mrb[9].mxu0 }
 0x2db   : > { %v3104_v17 = vadd.f32 %v3996_v56, %v6511_v47  ;;  %v3997_v63 = vpop.f32.mrb[14].mxu1 }
 0x2dc   : > { %v6366_v7 = vpop.f32.mrb[10].mxu0  ;;  %v3998_v30 = vpop.f32.mrb[15].mxu1 }
 0x2dd   : > { %v3999_v34 = vadd.f32 %v3998_v30, %v3997_v63  ;;  %v6368_v60 = vpop.f32.mrb[11].mxu0 }
 0x2df   : > { %v3109_v18 = vadd.f32 %v6512_v29, %v3999_v34  ;;  %v4000_v10 = vpop.f32.mrb[16].mxu1 }
 0x2e0   : > { %v4001_v12 = vpop.f32.mrb[17].mxu1 }
 0x2e1   : > { %v4002_v45 = vadd.f32 %v4001_v12, %v4000_v10 }
 0x2e3   : > { %v4003_v11 = vpop.f32.mrb[18].mxu1 }
 0x2e4   : > { %v4004_v16 = vpop.f32.mrb[19].mxu1 }
 0x2e5   : > { %v4005_v62 = vadd.f32 %v4004_v16, %v4003_v11 }
 0x2e7   : > { %v4006_v15 = vpop.f32.mrb[20].mxu1 }
 0x2e8   : > { %v4007_v32 = vpop.f32.mrb[21].mxu1 }
 0x2e9   : > { %v4008_v13 = vadd.f32 %v4007_v32, %v4006_v15 }
 0x2eb   : > { %v4009_v38 = vpop.f32.mrb[22].mxu1 }
 0x2ec   : > { %v4010_v55 = vpop.f32.mrb[23].mxu1 }
 0x2ed   : > { %v4011_v25 = vadd.f32 %v4010_v55, %v4009_v38 }
 0x2ef   : > { %v4044_v49 = vpop.f32.mrb[24].mxu1 }
 0x2f0   : > { %v4045_v37 = vpop.f32.mrb[25].mxu1 }
 0x2f1   : > { %v4046_v24 = vadd.f32 %v4045_v37, %v4044_v49 }
 0x2f3   : > { %v3199_v23 = vadd.f32 %v4046_v24, %v6513_v42  ;;  %v4047_v14 = vpop.f32.mrb[26].mxu1 }
 0x2f4   : > { %v4048_v39 = vpop.f32.mrb[27].mxu1 }
 0x2f5   : > { %v4049_v54 = vadd.f32 %v4048_v39, %v4047_v14 }
 0x2f7   : > { %v3204_v46 = vadd.f32 %v4049_v54, %v3099_v26  ;;  %v4050_v8 = vpop.f32.mrb[28].mxu1 }
 0x2f8   : > { %v4051_v41 = vpop.f32.mrb[29].mxu1 }
 0x2f9   : > { %v4052_v33 = vadd.f32 %v4051_v41, %v4050_v8  ;;  %v3859_v41 = vld [vmem:[%s6450_s6] ss:$0 sm:$0xff] }
 0x2fb   : > { %v3209_v44 = vadd.f32 %v4052_v33, %v3104_v17  ;;  %v4053_v51 = vpop.f32.mrb[30].mxu1 }
 0x2fc   : > { %v4054_v1 = vpop.f32.mrb[31].mxu1 }
 0x2fd   : > { %v4055_v28 = vadd.f32 %v4054_v1, %v4053_v51 }
 0x2ff   : > { %v3214_v58 = vadd.f32 %v4055_v28, %v3109_v18  ;;  %v4056_v6 = vpop.f32.mrb[32].mxu1 }
 0x300   : > { %v4057_v48 = vpop.f32.mrb[33].mxu1 }
 0x301   : > { %v4058_v2 = vadd.f32 %v4057_v48, %v4056_v6 }
 0x303   : > { %v4588_v22 = vadd.f32 %v4058_v2, %v4002_v45  ;;  %v4059_v5 = vpop.f32.mrb[34].mxu1 }
 0x304   : > { %v4060_v57 = vpop.f32.mrb[35].mxu1 }
 0x305   : > { %v4061_v53 = vadd.f32 %v4060_v57, %v4059_v5 }
 0x307   : > { %v4584_v52 = vadd.f32 %v4061_v53, %v4005_v62  ;;  %v4062_v31 = vpop.f32.mrb[36].mxu1 }
 0x308   : > { %v4063_v59 = vpop.f32.mrb[37].mxu1 }
 0x309   : > { %v4064_v35 = vadd.f32 %v4063_v59, %v4062_v31 }
 0x30b   : > { %v4596_v9 = vadd.f32 %v4064_v35, %v4008_v13  ;;  %v4065_v4 = vpop.f32.mrb[38].mxu1 }
 0x30c   : > { %v4066_v27 = vpop.f32.mrb[39].mxu1 }
 0x30d   : > { %v4067_v50 = vadd.f32 %v4066_v27, %v4065_v4 }
 0x30f   : > { %v4592_v61 = vadd.f32 %v4067_v50, %v4011_v25  ;;  %v4100_v20 = vpop.f32.mrb[40].mxu1 }
 0x310   : > { %v4101_v0 = vpop.f32.mrb[41].mxu1 }
 0x311   : > { %v4102_v19 = vadd.f32 %v4101_v0, %v4100_v20 }
 0x313   : > { %v3304_v21 = vadd.f32 %v4102_v19, %v3199_v23  ;;  %v4103_v26 = vpop.f32.mrb[42].mxu1 }
 0x314   : > { %v4104_v3 = vpop.f32.mrb[43].mxu1 }
 0x315   : > { %v4105_v43 = vadd.f32 %v4104_v3, %v4103_v26 }
 0x317   : > { %v3309_v56 = vadd.f32 %v4105_v43, %v3204_v46  ;;  %v4106_v47 = vpop.f32.mrb[44].mxu1 }
 0x318   : > { %v4107_v17 = vpop.f32.mrb[45].mxu1 }
 0x319   : > { %v4108_v63 = vadd.f32 %v4107_v17, %v4106_v47 }
 0x31b   : > { %v3314_v30 = vadd.f32 %v4108_v63, %v3209_v44  ;;  %v4109_v34 = vpop.f32.mrb[46].mxu1 }
 0x31c   : > { %v4110_v29 = vpop.f32.mrb[47].mxu1 }
 0x31d   : > { %v4111_v18 = vadd.f32 %v4110_v29, %v4109_v34 }
 0x31f   : > { %v3319_v10 = vadd.f32 %v4111_v18, %v3214_v58  ;;  %v4112_v12 = vpop.f32.mrb[48].mxu1 }
 0x320   : > { %v4113_v45 = vpop.f32.mrb[49].mxu1 }
 0x321   : > { %v4114_v11 = vadd.f32 %v4113_v45, %v4112_v12 }
 0x323   : > { %v4589_v16 = vadd.f32 %v4588_v22, %v4114_v11  ;;  %v4115_v62 = vpop.f32.mrb[50].mxu1 }
 0x324   : > { %v4116_v15 = vpop.f32.mrb[51].mxu1 }
 0x325   : > { %v4117_v32 = vadd.f32 %v4116_v15, %v4115_v62 }
 0x327   : > { %v4585_v13 = vadd.f32 %v4584_v52, %v4117_v32  ;;  %v4118_v38 = vpop.f32.mrb[52].mxu1 }
 0x328   : > { %v4119_v55 = vpop.f32.mrb[53].mxu1 }
 0x329   : > { %v4120_v25 = vadd.f32 %v4119_v55, %v4118_v38 }
 0x32b   : > { %v4597_v49 = vadd.f32 %v4596_v9, %v4120_v25  ;;  %v4121_v37 = vpop.f32.mrb[54].mxu1 }
 0x32c   : > { %v4122_v24 = vpop.f32.mrb[55].mxu1 }
 0x32d   : > { %v4123_v42 = vadd.f32 %v4122_v24, %v4121_v37 }
 0x32f   : > { %v4593_v23 = vadd.f32 %v4592_v61, %v4123_v42  ;;  %v4156_v14 = vpop.f32.mrb[56].mxu1 }
 0x330   : > { %v4157_v39 = vpop.f32.mrb[57].mxu1 }
 0x331   : > { %v4158_v54 = vadd.f32 %v4157_v39, %v4156_v14 }
 0x333   : > { %v3409_v46 = vadd.f32 %v4158_v54, %v3304_v21  ;;  %v4159_v8 = vpop.f32.mrb[58].mxu1 }
 0x334   : > { %v4160_v33 = vpop.f32.mrb[59].mxu1 }
 0x335   : > { %v3514_v44 = vadd.f32 %v6363_v40, %v3409_v46  ;;  %v4161_v51 = vadd.f32 %v4160_v33, %v4159_v8 }
 0x337   : > { %v3559_v1 = vadd.f32 %v3859_v41, %v3514_v44  ;;  %v3414_v28 = vadd.f32 %v4161_v51, %v3309_v56  ;;  %v4162_v58 = vpop.f32.mrb[60].mxu1 }
 0x338   : > { %v4163_v6 = vpop.f32.mrb[61].mxu1 }
 0x339   : > { %3567 = vst [vmem:[%s6379_s15] sm:$0xff] %v3559_v1  ;;  %v3519_v48 = vadd.f32 %v6361_v36, %v3414_v28  ;;  %v4164_v2 = vadd.f32 %v4163_v6, %v4162_v58 }
 0x33b   : > { %v3560_v22 = vadd.f32 %v3859_v41, %v3519_v48  ;;  %v3419_v5 = vadd.f32 %v4164_v2, %v3314_v30  ;;  %v4165_v57 = vpop.f32.mrb[62].mxu1 }
 0x33c   : > { %v4166_v53 = vpop.f32.mrb[63].mxu1 }
 0x33d   : > { %3568 = vst [vmem:[%s6379_s15 + $0x8] sm:$0xff] %v3560_v22  ;;  %v3524_v40 = vadd.f32 %v6368_v60, %v3419_v5  ;;  %v4167_v52 = vadd.f32 %v4166_v53, %v4165_v57 }
 0x33f   : > { %v3561_v31 = vadd.f32 %v3859_v41, %v3524_v40  ;;  %v3424_v59 = vadd.f32 %v4167_v52, %v3319_v10  ;;  %v4168_v35 = vpop.f32.mrb[64].mxu1 }
 0x340   : > { %v4169_v9 = vpop.f32.mrb[65].mxu1 }
 0x341   : > { %3569 = vst [vmem:[%s6379_s15 + $0x10] sm:$0xff] %v3561_v31  ;;  %v3529_v4 = vadd.f32 %v6366_v7, %v3424_v59  ;;  %v4170_v27 = vadd.f32 %v4169_v9, %v4168_v35 }
 0x343   : > { %v3562_v50 = vadd.f32 %v3859_v41, %v3529_v4  ;;  %v4171_v36 = vpop.f32.mrb[66].mxu1  ;;  %v4590_v61 = vadd.f32 %v4589_v16, %v4170_v27 }
 0x344   : > { %v4172_v20 = vpop.f32.mrb[67].mxu1 }
 0x345   : > { %3570 = vst [vmem:[%s6379_s15 + $0x18] sm:$0xff] %v3562_v50  ;;  %v4173_v0 = vadd.f32 %v4172_v20, %v4171_v36 }
 0x347   : > { %v4174_v19 = vpop.f32.mrb[68].mxu1  ;;  %v4586_v21 = vadd.f32 %v4585_v13, %v4173_v0 }
 0x348   : > { %v4175_v60 = vpop.f32.mrb[69].mxu1 }
 0x349   : > { %v4176_v26 = vadd.f32 %v4175_v60, %v4174_v19 }
 0x34b   : > { %v4177_v3 = vpop.f32.mrb[70].mxu1  ;;  %v4598_v43 = vadd.f32 %v4597_v49, %v4176_v26 }
 0x34c   : > { %v4178_v56 = vpop.f32.mrb[71].mxu1 }
 0x34d   : > { %v4179_v47 = vadd.f32 %v4178_v56, %v4177_v3 }
 0x34f   : > { %v4384_v7 = vpop.f32.mrb[4].mxu1  ;;  %v4594_v17 = vadd.f32 %v4593_v23, %v4179_v47 }
 0x350   : > { %v4587_v63 = vadd.f32 %v4586_v21, %v4384_v7  ;;  %v3533_v30 = vpop.f32.mrb[5].mxu1 }
 0x351   : > { %v4591_v34 = vadd.f32 %v4590_v61, %v3533_v30 }
 0x352   : > { %v3564_v29 = vadd.f32 %v4587_v63, %v3859_v41 }
 0x353   : > { %v3563_v18 = vadd.f32 %v4591_v34, %v3859_v41  ;;  %v4387_v10 = vpop.f32.mrb[6].mxu1 }
 0x354   : > { %3572 = vst [vmem:[%s6379_s15 + $0x28] sm:$0xff] %v3564_v29  ;;  %v4595_v12 = vadd.f32 %v4594_v17, %v4387_v10  ;;  %v3543_v45 = vpop.f32.mrb[7].mxu1 }
 0x355   : > { %3571 = vst [vmem:[%s6379_s15 + $0x20] sm:$0xff] %v3563_v18  ;;  %v4599_v11 = vadd.f32 %v4598_v43, %v3543_v45 }
 0x356   : > { %v3566_v16 = vadd.f32 %v4595_v12, %v3859_v41 }
 0x357   : > { %v3565_v62 = vadd.f32 %v4599_v11, %v3859_v41 }
 0x358   : > { %3574 = vst [vmem:[%s6379_s15 + $0x38] sm:$0xff] %v3566_v16 }
 0x359   : > { %3573 = vst [vmem:[%s6379_s15 + $0x30] sm:$0xff] %v3565_v62 }
 0x35a   : > { %4727 = shalt.err (!%p4724_p3)
}
 0x35b   : > { %s4728_s29 = scalar_lea.hbm %s6395_s20, 1024  ;;  %s4732_s14 = scalar_lea.hbm %s6451_s7, 2048 }
 0x35c   : > { %p4729_p4 = scmp.ne.s32.totalorder %s6395_s20, %s4728_s29  ;;  %p4733_p9 = scmp.lt.u32.totalorder %s6395_s20, %s6451_s7 }
 0x35d   : > { %p4734_p10 = scmp.lt.u32.totalorder %s4732_s14, %s4728_s29  ;;  %p4736_p12 = scmp.lt.u32.totalorder %s4728_s29, %s6395_s20 }
 0x35e   : > { %p4730_p7 = pnand %p4729_p4, %p4861_p5 }
 0x35f   : > { %p4735_p11 = por %p4734_p10, %p4733_p9 }
 0x360   : > { %p4731_p8 = pneg %p4730_p7 }
 0x361   : > { %p4737_p13 = por %p4736_p12, %p4735_p11 }
 0x363   : > { %p4738_p0 = pnand %p4737_p13, %p4731_p8 }
 0x365   : > { %4741 = shalt.err (!%p4738_p0)
}
 0x366   : > { %s4781_s18 = smov 128   ;;  %s4782_s19 = smov 8  }
 0x367   : > { %4668 = dma.vmem_to_hbm [thread:$0]  (%p4861_p5), %s6397_s17, 1024, %s6395_s20, %s6403_s28, %s4781_s18, %s4781_s18, %s4782_s19  }
 0x368 PF: > { %p4674_p1 = scmp.ge.s32.totalorder %s4776_s27, 2  ;;  %s3604_s22 = sand.u32 1, %s4764_s24  }
 0x369   : > { %s3605_s23 = scalar_lea.sflag [#allocation6], %s3604_s22 }
 0x36a   : > { %p4671_p2 = pnand %p4674_p1, %p4865_p6 }
 0x36c   : > { %4759 = dma.done.wait (!%p4671_p2), %s3605_s23, 1024  }
 0x36d   : > { %4761 = vsyncadd (!%p4671_p2), %s3605_s23, 4294966272  ;;  %p17_p3 = scmp.ge.s32.totalorder %s4848_s30, 4   ;;  %s6514_s24 = smov %s4768_s25 }
 0x36e   : > { %s6515_s25 = smov %s4772_s26  ;;  %s6516_s26 = smov %s4859_s10 }
 0x36f   : > { %s6517_s27 = smov %s4848_s30  ;;  %19 = sbr.rel (!%p17_p3) target bundleno = 3 (0x3), region = 98 }
 0x376   :  { %3610 = vsyncpa [#allocation6], 1 }
 0x377   :  { %3612 = vsyncpa [#allocation6 + $0x1], 1 }

</bundles_post_ra>
